<compile_context>
chip_gen: v5e
topology: v5e:2x2
jax: 0.10.0
libtpu: 0.0.40
codegen_flags: <defaults>
</compile_context>

<pallas_src>
import functools

import jax
import jax.numpy as jnp
from jax import lax
from jax.experimental import pallas as pl
from jax.experimental.pallas import tpu as pltpu


def _contrast_kernel(*refs, inv_tau, symmetric):
    if symmetric:
        (z_mg_ref, z_sc_ref, w1t_ref, b1_ref, w2t_ref, b2_ref,
         pos_ref,
         mp_ref, colsum_ref, colpos_ref,
         zsct_ref) = refs
        post_ref = pos_ref
    else:
        (z_mg_ref, z_sc_ref, w1t_ref, b1_ref, w2t_ref, b2_ref,
         pos_ref, post_ref,
         mp_ref, colsum_ref, colpos_ref,
         zsct_ref) = refs

    i = pl.program_id(1)   # inner ("arbitrary") axis; outer axis is parallel

    def project(x):
        # Shared 2-layer MLP with ELU(alpha=1).  Projection stays in f32
        # (tiny [*, hp] x [hp, hp] matmuls); only the big similarity matmul
        # uses bf16 operands.
        h = jnp.dot(x, w1t_ref[...], preferred_element_type=jnp.float32) + b1_ref[...]
        h = jnp.where(h > 0.0, h, jnp.exp(h) - 1.0)
        return jnp.dot(h, w2t_ref[...], preferred_element_type=jnp.float32) + b2_ref[...]

    @pl.when(i == 0)
    def _init():
        # Project + L2-normalize z_sc once per outer block (i.e. once per
        # TensorCore on v7x) and cache it as bf16 for the MXU; zero the
        # per-outer-block column accumulators.
        y = project(z_sc_ref[...])                              # [n, hp] f32
        inv = lax.rsqrt(jnp.sum(y * y, axis=-1, keepdims=True))
        zsct_ref[...] = (y * inv).astype(jnp.bfloat16)          # [n, hp] bf16
        colsum_ref[...] = jnp.zeros_like(colsum_ref)
        colpos_ref[...] = jnp.zeros_like(colpos_ref)

    # Project + normalize the z_mg row block; 1/tau is folded into the scale.
    y = project(z_mg_ref[...])                                  # [tm, hp] f32
    inv = lax.rsqrt(jnp.sum(y * y, axis=-1, keepdims=True)) * inv_tau
    zp = (y * inv).astype(jnp.bfloat16)                         # [tm, hp] bf16

    # s[i, j] = exp(cos(zp_mp_i, zp_sc_j) / tau).  NT contraction on the
    # feature axis of both bf16 operands (flash-attention QK^T pattern) ->
    # native MXU transposed-RHS path, f32 accumulation.
    s = jnp.exp(lax.dot_general(zp, zsct_ref[...],
                                (((1,), (1,)), ((), ())),
                                preferred_element_type=jnp.float32))   # [tm, n]

    tm, n = s.shape

    def masked(mref):
        m = mref[...]
        if m.dtype != jnp.bool_:
            m = m != 0
        return jnp.where(m, s, 0.0)

    s_pos = masked(pos_ref)
    s_post = s_pos if symmetric else masked(post_ref)

    # mp direction: per-row log terms written straight out (no accumulator);
    # log-of-quotient avoids materializing the row-normalized matrix.
    row_sum = jnp.sum(s, axis=1, keepdims=True)                 # [tm, 1]
    row_pos = jnp.sum(s_pos, axis=1, keepdims=True)             # [tm, 1]
    mp_ref[...] = jnp.log(row_pos) - jnp.log(row_sum + 1e-8)

    # sc direction: s.T is never formed -- only column reductions of s are
    # needed.  Keep them sublane-spread as (8, n) (no per-step 8->1 sublane
    # reduce) and accumulate into the per-outer-block output block.
    s3 = s.reshape(tm // 8, 8, n)
    colsum_ref[...] += jnp.sum(s3, axis=0, keepdims=True)                  # (1,8,n)
    colpos_ref[...] += jnp.sum(s_post.reshape(tm // 8, 8, n),
                               axis=0, keepdims=True)                      # (1,8,n)


def contrast_forward(z_mg, z_sc, pos_dense, w1, b1, w2, b2, tau, lam,
                     tm=None, pos_symmetric=None):
    """Pallas implementation of Contrast.forward (pos_dense = densified COO)."""
    n, h = z_mg.shape
    assert z_sc.shape == (n, h) and pos_dense.shape == (n, n)
    if n % 8 != 0:
        raise ValueError("N must be a multiple of 8 (f32 sublane)")

    f32 = jnp.float32
    # Zero-pad the feature axis to a full 128-lane multiple (numerically exact:
    # zero features / weights / biases contribute nothing, ELU(0)=0).
    hp = max(128, ((h + 127) // 128) * 128)

    pos_c = jnp.asarray(pos_dense)
    if pos_symmetric is None:
        try:
            pos_symmetric = bool(jnp.array_equal(pos_c, pos_c.T))
        except Exception:
            pos_symmetric = False      # traced under jit -> keep both streams
    n_masks = 1 if pos_symmetric else 2

    # Generation-aware VMEM budget (v5e/v6e: 128 MiB, v7x: 64 MiB per core).
    try:
        vmem_cap = int(pltpu.get_tpu_info().vmem_capacity_bytes)
    except Exception:
        vmem_cap = 64 * 1024 * 1024

    if tm is None:
        resident = n * hp * 4 + n * hp * 2 + 4 * hp * hp * 4 + 2 * 8 * n * 4 + (1 << 20)
        budget = int(0.75 * vmem_cap)
        tm = 8
        for cand in (512, 256, 128, 64, 32, 16, 8):
            if n % cand != 0:
                continue
            mb = 1 if cand % 32 == 0 else (2 if cand % 16 == 0 else 4)
            step = (2 * cand * hp * 4                 # z_mg, double-buffered
                    + 2 * n_masks * cand * n * mb     # mask stream(s), double-buffered
                    + 20 * cand * n                   # f32 [tm, n] temporaries
                    + 2 * cand * 4)
            if resident + step <= budget:
                tm = cand
                break
    assert n % tm == 0 and tm % 8 == 0

    # 0/1 mask dtype: 1-byte bool when the tile packs cleanly, else bf16 / f32.
    if tm % 32 == 0:
        mask_dtype = jnp.bool_
    elif tm % 16 == 0:
        mask_dtype = jnp.bfloat16
    else:
        mask_dtype = f32

    nblk = n // tm
    n_outer = 2 if nblk % 2 == 0 else 1     # parallel axis (2 TCs on v7x)
    n_inner = nblk // n_outer

    def pad2(a, rows, cols):
        a = jnp.asarray(a, f32)
        return jnp.pad(a, ((0, rows - a.shape[0]), (0, cols - a.shape[1])))

    z_mg_p = pad2(z_mg, n, hp)
    z_sc_p = pad2(z_sc, n, hp)
    w1t = pad2(jnp.asarray(w1, f32).T, hp, hp)      # [in, out]
    w2t = pad2(jnp.asarray(w2, f32).T, hp, hp)
    b1p = pad2(jnp.reshape(jnp.asarray(b1, f32), (1, h)), 1, hp)
    b2p = pad2(jnp.reshape(jnp.asarray(b2, f32), (1, h)), 1, hp)

    posf = jnp.asarray(pos_c, f32)
    if mask_dtype == jnp.bool_:
        pos_m = posf != 0
        post_m = None if pos_symmetric else (posf.T != 0)
    else:
        pos_m = posf.astype(mask_dtype)
        post_m = None if pos_symmetric else posf.T.astype(mask_dtype)

    row_idx = lambda o, i: (o * n_inner + i, 0)

    def invariant(shape):
        # Loop-invariant operand: single-buffered (no pointless double buffer).
        return pl.BlockSpec(shape, lambda o, i: (0, 0),
                            pipeline_mode=pl.Buffered(1))

    in_specs = [
        pl.BlockSpec((tm, hp), row_idx),     # z_mg row block (streamed)
        invariant((n, hp)),                  # z_sc (resident)
        invariant((hp, hp)),                 # W1^T
        invariant((1, hp)),                  # b1
        invariant((hp, hp)),                 # W2^T
        invariant((1, hp)),                  # b2
        pl.BlockSpec((tm, n), row_idx),      # pos row block (streamed)
    ]
    inputs = [z_mg_p, z_sc_p, w1t, b1p, w2t, b2p, pos_m]
    if not pos_symmetric:
        in_specs.append(pl.BlockSpec((tm, n), row_idx))   # pos.T row block
        inputs.append(post_m)

    out_shape = (
        jax.ShapeDtypeStruct((n, 1), f32),             # per-row mp log terms
        jax.ShapeDtypeStruct((n_outer, 8, n), f32),    # column-sum partials
        jax.ShapeDtypeStruct((n_outer, 8, n), f32),    # masked column-sum partials
    )
    out_specs = (
        pl.BlockSpec((tm, 1), row_idx),
        pl.BlockSpec((1, 8, n), lambda o, i: (o, 0, 0)),
        pl.BlockSpec((1, 8, n), lambda o, i: (o, 0, 0)),
    )
    scratch_shapes = [pltpu.VMEM((n, hp), jnp.bfloat16)]   # normalized z_sc proj

    # Stay within the per-core VMEM of the current generation (v7x: ~54 MiB).
    vmem_limit = int(min(0.85 * vmem_cap, 100 * 1024 * 1024))

    kernel = functools.partial(_contrast_kernel,
                               inv_tau=1.0 / float(tau),
                               symmetric=bool(pos_symmetric))

    mp_rows, colsum_p, colpos_p = pl.pallas_call(
        kernel,
        out_shape=out_shape,
        grid_spec=pltpu.PrefetchScalarGridSpec(
            num_scalar_prefetch=0,
            grid=(n_outer, n_inner),
            in_specs=in_specs,
            out_specs=out_specs,
            scratch_shapes=scratch_shapes),
        compiler_params=pltpu.CompilerParams(
            dimension_semantics=("parallel", "arbitrary"),
            vmem_limit_bytes=vmem_limit),
    )(*inputs)

    # Tiny final reduction in plain JAX (keeps the grid fully parallelizable).
    colsum = jnp.sum(colsum_p, axis=(0, 1))             # [n]
    colpos = jnp.sum(colpos_p, axis=(0, 1))              # [n]
    lam = float(lam)
    lori_mp = -jnp.mean(mp_rows)
    lori_sc = -jnp.mean(jnp.log(colpos) - jnp.log(colsum + 1e-8))
    return lam * lori_mp + (1.0 - lam) * lori_sc


def contrast_reference(z_mg, z_sc, pos, w1, b1, w2, b2, tau, lam):
    """Pure-JAX reference mirroring the PyTorch module."""
    def proj(x):
        h = x @ w1.T + b1
        h = jnp.where(h > 0.0, h, jnp.exp(h) - 1.0)
        return h @ w2.T + b2

    zp_mp, zp_sc = proj(z_mg), proj(z_sc)
    n_mp = jnp.linalg.norm(zp_mp, axis=-1, keepdims=True)
    n_sc = jnp.linalg.norm(zp_sc, axis=-1, keepdims=True)
    s = jnp.exp((zp_mp @ zp_sc.T) / (n_mp @ n_sc.T) / tau)
    st = s.T
    s = s / (jnp.sum(s, axis=1, keepdims=True) + 1e-8)
    st = st / (jnp.sum(st, axis=1, keepdims=True) + 1e-8)
    lori_mp = -jnp.mean(jnp.log(jnp.sum(s * pos, axis=-1)))
    lori_sc = -jnp.mean(jnp.log(jnp.sum(st * pos, axis=-1)))
    return lam * lori_mp + (1 - lam) * lori_sc


if __name__ == "__main__":
    N, H = 128, 32
    tau, lam = 0.8, 0.5

    key = jax.random.PRNGKey(0)
    k = jax.random.split(key, 6)

    z_mg = jax.random.normal(k[0], (N, H), jnp.float32)
    z_sc = jax.random.normal(k[1], (N, H), jnp.float32)

    # nn.Linear(H, H) params; xavier_normal_(gain=1.414) weights, default
    # uniform(-1/sqrt(H), 1/sqrt(H)) biases.
    std = 1.414 * (2.0 / (H + H)) ** 0.5
    w1 = std * jax.random.normal(k[2], (H, H), jnp.float32)
    w2 = std * jax.random.normal(k[3], (H, H), jnp.float32)
    bound = 1.0 / (H ** 0.5)
    b1 = jax.random.uniform(k[4], (H,), jnp.float32, -bound, bound)
    b2 = jax.random.uniform(k[5], (H,), jnp.float32, -bound, bound)

    # TODO(synk): scipy-COO -> dense conversion (and .cuda()) is host-side
    # glue with no Pallas equivalent; the positive mask is densified here.
    rows = jnp.arange(N)
    pos_asym = jnp.zeros((N, N), jnp.float32)
    pos_asym = pos_asym.at[rows, rows].set(1.0)                 # self positives
    pos_asym = pos_asym.at[rows, (rows + 1) % N].set(1.0)       # asymmetric edges
    pos_sym = jnp.maximum(pos_asym, pos_asym.T)                 # symmetric variant

    # Test 1: asymmetric positives, tm=32 -> bool mask path, dual mask streams,
    # grid (2, 2): exercises the parallel/arbitrary split + cross-block accum.
    loss1 = jax.block_until_ready(
        contrast_forward(z_mg, z_sc, pos_asym, w1, b1, w2, b2, tau, lam, tm=32))
    ref1 = contrast_reference(z_mg, z_sc, pos_asym, w1, b1, w2, b2, tau, lam)
    assert jnp.isfinite(loss1), "loss1 is not finite"
    # bf16 MXU operands -> ~1e-3 relative error vs the f32 reference.
    assert jnp.allclose(loss1, ref1, rtol=1.5e-2, atol=2e-3), (loss1, ref1)

    # Test 2: symmetric positives (single mask stream / symmetric kernel
    # variant), tm=16 -> bf16 mask fallback, grid (2, 4).
    loss2 = jax.block_until_ready(
        contrast_forward(z_mg, z_sc, pos_sym, w1, b1, w2, b2, tau, lam, tm=16))
    ref2 = contrast_reference(z_mg, z_sc, pos_sym, w1, b1, w2, b2, tau, lam)
    assert jnp.isfinite(loss2), "loss2 is not finite"
    assert jnp.allclose(loss2, ref2, rtol=1.5e-2, atol=2e-3), (loss2, ref2)

    print("KERNEL_OK")
</pallas_src>

<mosaic_0001>
module attributes {stable_mosaic.version = 11 : i64} {
  func.func @_contrast_kernel(%arg0: i32, %arg1: i32, %arg2: memref<32x128xf32, #tpu.memory_space<vmem>>, %arg3: memref<128x128xf32, #tpu.memory_space<vmem>>, %arg4: memref<128x128xf32, #tpu.memory_space<vmem>>, %arg5: memref<1x128xf32, #tpu.memory_space<vmem>>, %arg6: memref<128x128xf32, #tpu.memory_space<vmem>>, %arg7: memref<1x128xf32, #tpu.memory_space<vmem>>, %arg8: memref<32x128xi32, #tpu.memory_space<vmem>>, %arg9: memref<32x128xi32, #tpu.memory_space<vmem>>, %arg10: memref<32x1xf32, #tpu.memory_space<vmem>>, %arg11: memref<1x8x128xf32, #tpu.memory_space<vmem>>, %arg12: memref<1x8x128xf32, #tpu.memory_space<vmem>>, %arg13: memref<128x128xbf16, #tpu.memory_space<vmem>>) attributes {dimension_semantics = [#tpu.dimension_semantics<parallel>, #tpu.dimension_semantics<arbitrary>], iteration_bounds = array<i64: 2, 2>, scalar_prefetch = 0 : i64, scratch_operands = 1 : i64, tpu.core_type = #tpu.core_type<tc>, window_params = [{transform_indices = @transform_0, window_bounds = array<i64: 32, 128>}, {pipeline_mode = #tpu.pipeline_mode<synchronous>, transform_indices = @transform_1, window_bounds = array<i64: 128, 128>}, {pipeline_mode = #tpu.pipeline_mode<synchronous>, transform_indices = @transform_2, window_bounds = array<i64: 128, 128>}, {pipeline_mode = #tpu.pipeline_mode<synchronous>, transform_indices = @transform_3, window_bounds = array<i64: 1, 128>}, {pipeline_mode = #tpu.pipeline_mode<synchronous>, transform_indices = @transform_4, window_bounds = array<i64: 128, 128>}, {pipeline_mode = #tpu.pipeline_mode<synchronous>, transform_indices = @transform_5, window_bounds = array<i64: 1, 128>}, {transform_indices = @transform_6, window_bounds = array<i64: 32, 128>}, {transform_indices = @transform_7, window_bounds = array<i64: 32, 128>}, {transform_indices = @transform_8, window_bounds = array<i64: 32, 1>}, {transform_indices = @transform_9, window_bounds = array<i64: 1, 8, 128>}, {transform_indices = @transform_10, window_bounds = array<i64: 1, 8, 128>}]} {
    %c0_i32 = arith.constant 0 : i32
    %0 = arith.cmpi eq, %arg1, %c0_i32 : i32
    %1 = arith.extui %0 : i1 to i32
    %c0_i32_0 = arith.constant 0 : i32
    %2 = arith.cmpi ne, %1, %c0_i32_0 : i32
    scf.if %2 {
      %c0_45 = arith.constant 0 : index
      %c0_46 = arith.constant 0 : index
      %62 = vector.load %arg3[%c0_45, %c0_46] : memref<128x128xf32, #tpu.memory_space<vmem>>, vector<128x128xf32>
      %c0_47 = arith.constant 0 : index
      %c0_48 = arith.constant 0 : index
      %63 = vector.load %arg4[%c0_47, %c0_48] : memref<128x128xf32, #tpu.memory_space<vmem>>, vector<128x128xf32>
      %cst_49 = arith.constant dense<0.000000e+00> : vector<128x128xf32>
      %64 = tpu.matmul %62, %63, %cst_49 {dimension_numbers = #tpu.dot_dimension_numbers<[1], [0], [0], [1], [0, 0, 1, 1], [], []>} : vector<128x128xf32>, vector<128x128xf32>, vector<128x128xf32> -> vector<128x128xf32>
      %c0_50 = arith.constant 0 : index
      %c0_51 = arith.constant 0 : index
      %65 = vector.load %arg5[%c0_50, %c0_51] : memref<1x128xf32, #tpu.memory_space<vmem>>, vector<1x128xf32>
      %66 = vector.broadcast %65 : vector<1x128xf32> to vector<128x128xf32>
      %67 = arith.addf %64, %66 : vector<128x128xf32>
      %cst_52 = arith.constant 0.000000e+00 : f32
      %68 = vector.broadcast %cst_52 : f32 to vector<128x128xf32>
      %69 = arith.cmpf ogt, %67, %68 : vector<128x128xf32>
      %70 = math.exp %67 : vector<128x128xf32>
      %cst_53 = arith.constant 1.000000e+00 : f32
      %71 = vector.broadcast %cst_53 : f32 to vector<128x128xf32>
      %72 = arith.subf %70, %71 : vector<128x128xf32>
      %73 = arith.select %69, %67, %72 : vector<128x128xi1>, vector<128x128xf32>
      %c0_54 = arith.constant 0 : index
      %c0_55 = arith.constant 0 : index
      %74 = vector.load %arg6[%c0_54, %c0_55] : memref<128x128xf32, #tpu.memory_space<vmem>>, vector<128x128xf32>
      %cst_56 = arith.constant dense<0.000000e+00> : vector<128x128xf32>
      %75 = tpu.matmul %73, %74, %cst_56 {dimension_numbers = #tpu.dot_dimension_numbers<[1], [0], [0], [1], [0, 0, 1, 1], [], []>} : vector<128x128xf32>, vector<128x128xf32>, vector<128x128xf32> -> vector<128x128xf32>
      %c0_57 = arith.constant 0 : index
      %c0_58 = arith.constant 0 : index
      %76 = vector.load %arg7[%c0_57, %c0_58] : memref<1x128xf32, #tpu.memory_space<vmem>>, vector<1x128xf32>
      %77 = vector.broadcast %76 : vector<1x128xf32> to vector<128x128xf32>
      %78 = arith.addf %75, %77 : vector<128x128xf32>
      %79 = arith.mulf %78, %78 : vector<128x128xf32>
      %cst_59 = arith.constant dense<0.000000e+00> : vector<128xf32>
      %80 = vector.multi_reduction <add>, %79, %cst_59 [1] : vector<128x128xf32> to vector<128xf32>
      %81 = vector.shape_cast %80 : vector<128xf32> to vector<128x1xf32>
      %82 = math.rsqrt %81 : vector<128x1xf32>
      %83 = vector.broadcast %82 : vector<128x1xf32> to vector<128x128xf32>
      %84 = arith.mulf %78, %83 : vector<128x128xf32>
      %85 = arith.truncf %84 : vector<128x128xf32> to vector<128x128xbf16>
      %c0_60 = arith.constant 0 : index
      %c0_61 = arith.constant 0 : index
      %86 = vector.load %arg13[%c0_60, %c0_61] : memref<128x128xbf16, #tpu.memory_space<vmem>>, vector<128x128xbf16>
      tpu.vector_store %arg13[%c0_60, %c0_61], %85 {strides = array<i32>} : memref<128x128xbf16, #tpu.memory_space<vmem>>, vector<128x128xbf16>,
      %cst_62 = arith.constant 0.000000e+00 : f32
      %87 = vector.broadcast %cst_62 : f32 to vector<1x8x128xf32>
      %c0_63 = arith.constant 0 : index
      %c0_64 = arith.constant 0 : index
      %c0_65 = arith.constant 0 : index
      %88 = vector.load %arg11[%c0_63, %c0_64, %c0_65] : memref<1x8x128xf32, #tpu.memory_space<vmem>>, vector<1x8x128xf32>
      tpu.vector_store %arg11[%c0_63, %c0_64, %c0_65], %87 {strides = array<i32>} : memref<1x8x128xf32, #tpu.memory_space<vmem>>, vector<1x8x128xf32>,
      %cst_66 = arith.constant 0.000000e+00 : f32
      %89 = vector.broadcast %cst_66 : f32 to vector<1x8x128xf32>
      %c0_67 = arith.constant 0 : index
      %c0_68 = arith.constant 0 : index
      %c0_69 = arith.constant 0 : index
      %90 = vector.load %arg12[%c0_67, %c0_68, %c0_69] : memref<1x8x128xf32, #tpu.memory_space<vmem>>, vector<1x8x128xf32>
      tpu.vector_store %arg12[%c0_67, %c0_68, %c0_69], %89 {strides = array<i32>} : memref<1x8x128xf32, #tpu.memory_space<vmem>>, vector<1x8x128xf32>,
    } else {
    }
    %c0 = arith.constant 0 : index
    %c0_1 = arith.constant 0 : index
    %3 = vector.load %arg2[%c0, %c0_1] : memref<32x128xf32, #tpu.memory_space<vmem>>, vector<32x128xf32>
    %c0_2 = arith.constant 0 : index
    %c0_3 = arith.constant 0 : index
    %4 = vector.load %arg4[%c0_2, %c0_3] : memref<128x128xf32, #tpu.memory_space<vmem>>, vector<128x128xf32>
    %cst = arith.constant dense<0.000000e+00> : vector<32x128xf32>
    %5 = tpu.matmul %3, %4, %cst {dimension_numbers = #tpu.dot_dimension_numbers<[1], [0], [0], [1], [0, 0, 1, 1], [], []>} : vector<32x128xf32>, vector<128x128xf32>, vector<32x128xf32> -> vector<32x128xf32>
    %c0_4 = arith.constant 0 : index
    %c0_5 = arith.constant 0 : index
    %6 = vector.load %arg5[%c0_4, %c0_5] : memref<1x128xf32, #tpu.memory_space<vmem>>, vector<1x128xf32>
    %7 = vector.broadcast %6 : vector<1x128xf32> to vector<32x128xf32>
    %8 = arith.addf %5, %7 : vector<32x128xf32>
    %cst_6 = arith.constant 0.000000e+00 : f32
    %9 = vector.broadcast %cst_6 : f32 to vector<32x128xf32>
    %10 = arith.cmpf ogt, %8, %9 : vector<32x128xf32>
    %11 = math.exp %8 : vector<32x128xf32>
    %cst_7 = arith.constant 1.000000e+00 : f32
    %12 = vector.broadcast %cst_7 : f32 to vector<32x128xf32>
    %13 = arith.subf %11, %12 : vector<32x128xf32>
    %14 = arith.select %10, %8, %13 : vector<32x128xi1>, vector<32x128xf32>
    %c0_8 = arith.constant 0 : index
    %c0_9 = arith.constant 0 : index
    %15 = vector.load %arg6[%c0_8, %c0_9] : memref<128x128xf32, #tpu.memory_space<vmem>>, vector<128x128xf32>
    %cst_10 = arith.constant dense<0.000000e+00> : vector<32x128xf32>
    %16 = tpu.matmul %14, %15, %cst_10 {dimension_numbers = #tpu.dot_dimension_numbers<[1], [0], [0], [1], [0, 0, 1, 1], [], []>} : vector<32x128xf32>, vector<128x128xf32>, vector<32x128xf32> -> vector<32x128xf32>
    %c0_11 = arith.constant 0 : index
    %c0_12 = arith.constant 0 : index
    %17 = vector.load %arg7[%c0_11, %c0_12] : memref<1x128xf32, #tpu.memory_space<vmem>>, vector<1x128xf32>
    %18 = vector.broadcast %17 : vector<1x128xf32> to vector<32x128xf32>
    %19 = arith.addf %16, %18 : vector<32x128xf32>
    %20 = arith.mulf %19, %19 : vector<32x128xf32>
    %cst_13 = arith.constant dense<0.000000e+00> : vector<32xf32>
    %21 = vector.multi_reduction <add>, %20, %cst_13 [1] : vector<32x128xf32> to vector<32xf32>
    %22 = vector.shape_cast %21 : vector<32xf32> to vector<32x1xf32>
    %23 = math.rsqrt %22 : vector<32x1xf32>
    %cst_14 = arith.constant 1.250000e+00 : f32
    %24 = vector.broadcast %cst_14 : f32 to vector<32x1xf32>
    %25 = arith.mulf %23, %24 : vector<32x1xf32>
    %26 = vector.broadcast %25 : vector<32x1xf32> to vector<32x128xf32>
    %27 = arith.mulf %19, %26 : vector<32x128xf32>
    %28 = arith.truncf %27 : vector<32x128xf32> to vector<32x128xbf16>
    %c0_15 = arith.constant 0 : index
    %c0_16 = arith.constant 0 : index
    %29 = vector.load %arg13[%c0_15, %c0_16] : memref<128x128xbf16, #tpu.memory_space<vmem>>, vector<128x128xbf16>
    %cst_17 = arith.constant dense<0.000000e+00> : vector<32x128xf32>
    %30 = tpu.matmul %28, %29, %cst_17 {dimension_numbers = #tpu.dot_dimension_numbers<[1], [1], [0], [0], [0, 0, 1, 0], [], []>} : vector<32x128xbf16>, vector<128x128xbf16>, vector<32x128xf32> -> vector<32x128xf32>
    %31 = math.exp %30 : vector<32x128xf32>
    %c0_18 = arith.constant 0 : index
    %c0_19 = arith.constant 0 : index
    %32 = vector.load %arg8[%c0_18, %c0_19] : memref<32x128xi32, #tpu.memory_space<vmem>>, vector<32x128xi32>
    %cst_20 = arith.constant dense<0> : vector<32x128xi32>
    %33 = arith.cmpi ne, %32, %cst_20 : vector<32x128xi32>
    %cst_21 = arith.constant 0.000000e+00 : f32
    %34 = vector.broadcast %cst_21 : f32 to vector<32x128xf32>
    %35 = arith.select %33, %31, %34 : vector<32x128xi1>, vector<32x128xf32>
    %c0_22 = arith.constant 0 : index
    %c0_23 = arith.constant 0 : index
    %36 = vector.load %arg9[%c0_22, %c0_23] : memref<32x128xi32, #tpu.memory_space<vmem>>, vector<32x128xi32>
    %cst_24 = arith.constant dense<0> : vector<32x128xi32>
    %37 = arith.cmpi ne, %36, %cst_24 : vector<32x128xi32>
    %cst_25 = arith.constant 0.000000e+00 : f32
    %38 = vector.broadcast %cst_25 : f32 to vector<32x128xf32>
    %39 = arith.select %37, %31, %38 : vector<32x128xi1>, vector<32x128xf32>
    %cst_26 = arith.constant dense<0.000000e+00> : vector<32xf32>
    %40 = vector.multi_reduction <add>, %31, %cst_26 [1] : vector<32x128xf32> to vector<32xf32>
    %41 = vector.shape_cast %40 : vector<32xf32> to vector<32x1xf32>
    %cst_27 = arith.constant dense<0.000000e+00> : vector<32xf32>
    %42 = vector.multi_reduction <add>, %35, %cst_27 [1] : vector<32x128xf32> to vector<32xf32>
    %43 = vector.shape_cast %42 : vector<32xf32> to vector<32x1xf32>
    %44 = math.log %43 : vector<32x1xf32>
    %cst_28 = arith.constant 9.99999993E-9 : f32
    %45 = vector.broadcast %cst_28 : f32 to vector<32x1xf32>
    %46 = arith.addf %41, %45 : vector<32x1xf32>
    %47 = math.log %46 : vector<32x1xf32>
    %48 = arith.subf %44, %47 : vector<32x1xf32>
    %c0_29 = arith.constant 0 : index
    %c0_30 = arith.constant 0 : index
    %49 = vector.load %arg10[%c0_29, %c0_30] : memref<32x1xf32, #tpu.memory_space<vmem>>, vector<32x1xf32>
    tpu.vector_store %arg10[%c0_29, %c0_30], %48 {strides = array<i32>} : memref<32x1xf32, #tpu.memory_space<vmem>>, vector<32x1xf32>,
    %50 = vector.shape_cast %31 : vector<32x128xf32> to vector<4x8x128xf32>
    %c0_31 = arith.constant 0 : index
    %c0_32 = arith.constant 0 : index
    %c0_33 = arith.constant 0 : index
    %51 = vector.load %arg11[%c0_31, %c0_32, %c0_33] : memref<1x8x128xf32, #tpu.memory_space<vmem>>, vector<1x8x128xf32>
    %cst_34 = arith.constant dense<0.000000e+00> : vector<8x128xf32>
    %52 = vector.multi_reduction <add>, %50, %cst_34 [0] : vector<4x8x128xf32> to vector<8x128xf32>
    %53 = vector.shape_cast %52 : vector<8x128xf32> to vector<1x8x128xf32>
    %54 = arith.addf %51, %53 : vector<1x8x128xf32>
    %c0_35 = arith.constant 0 : index
    %c0_36 = arith.constant 0 : index
    %c0_37 = arith.constant 0 : index
    %55 = vector.load %arg11[%c0_35, %c0_36, %c0_37] : memref<1x8x128xf32, #tpu.memory_space<vmem>>, vector<1x8x128xf32>
    tpu.vector_store %arg11[%c0_35, %c0_36, %c0_37], %54 {strides = array<i32>} : memref<1x8x128xf32, #tpu.memory_space<vmem>>, vector<1x8x128xf32>,
    %c0_38 = arith.constant 0 : index
    %c0_39 = arith.constant 0 : index
    %c0_40 = arith.constant 0 : index
    %56 = vector.load %arg12[%c0_38, %c0_39, %c0_40] : memref<1x8x128xf32, #tpu.memory_space<vmem>>, vector<1x8x128xf32>
    %57 = vector.shape_cast %39 : vector<32x128xf32> to vector<4x8x128xf32>
    %cst_41 = arith.constant dense<0.000000e+00> : vector<8x128xf32>
    %58 = vector.multi_reduction <add>, %57, %cst_41 [0] : vector<4x8x128xf32> to vector<8x128xf32>
    %59 = vector.shape_cast %58 : vector<8x128xf32> to vector<1x8x128xf32>
    %60 = arith.addf %56, %59 : vector<1x8x128xf32>
    %c0_42 = arith.constant 0 : index
    %c0_43 = arith.constant 0 : index
    %c0_44 = arith.constant 0 : index
    %61 = vector.load %arg12[%c0_42, %c0_43, %c0_44] : memref<1x8x128xf32, #tpu.memory_space<vmem>>, vector<1x8x128xf32>
    tpu.vector_store %arg12[%c0_42, %c0_43, %c0_44], %60 {strides = array<i32>} : memref<1x8x128xf32, #tpu.memory_space<vmem>>, vector<1x8x128xf32>,
    return
  }
  func.func @transform_0(%arg0: i32, %arg1: i32) -> (i32, i32) {
    %c2_i32 = arith.constant 2 : i32
    %0 = arith.muli %arg0, %c2_i32 : i32
    %1 = arith.addi %0, %arg1 : i32
    %c0_i32 = arith.constant 0 : i32
    %c0_i32_0 = arith.constant 0 : i32
    return %1, %c0_i32 : i32, i32
  }
  func.func @transform_1(%arg0: i32, %arg1: i32) -> (i32, i32) {
    %c0_i32 = arith.constant 0 : i32
    %c0_i32_0 = arith.constant 0 : i32
    %c0_i32_1 = arith.constant 0 : i32
    return %c0_i32, %c0_i32_0 : i32, i32
  }
  func.func @transform_2(%arg0: i32, %arg1: i32) -> (i32, i32) {
    %c0_i32 = arith.constant 0 : i32
    %c0_i32_0 = arith.constant 0 : i32
    %c0_i32_1 = arith.constant 0 : i32
    return %c0_i32, %c0_i32_0 : i32, i32
  }
  func.func @transform_3(%arg0: i32, %arg1: i32) -> (i32, i32) {
    %c0_i32 = arith.constant 0 : i32
    %c0_i32_0 = arith.constant 0 : i32
    %c0_i32_1 = arith.constant 0 : i32
    return %c0_i32, %c0_i32_0 : i32, i32
  }
  func.func @transform_4(%arg0: i32, %arg1: i32) -> (i32, i32) {
    %c0_i32 = arith.constant 0 : i32
    %c0_i32_0 = arith.constant 0 : i32
    %c0_i32_1 = arith.constant 0 : i32
    return %c0_i32, %c0_i32_0 : i32, i32
  }
  func.func @transform_5(%arg0: i32, %arg1: i32) -> (i32, i32) {
    %c0_i32 = arith.constant 0 : i32
    %c0_i32_0 = arith.constant 0 : i32
    %c0_i32_1 = arith.constant 0 : i32
    return %c0_i32, %c0_i32_0 : i32, i32
  }
  func.func @transform_6(%arg0: i32, %arg1: i32) -> (i32, i32) {
    %c2_i32 = arith.constant 2 : i32
    %0 = arith.muli %arg0, %c2_i32 : i32
    %1 = arith.addi %0, %arg1 : i32
    %c0_i32 = arith.constant 0 : i32
    %c0_i32_0 = arith.constant 0 : i32
    return %1, %c0_i32 : i32, i32
  }
  func.func @transform_7(%arg0: i32, %arg1: i32) -> (i32, i32) {
    %c2_i32 = arith.constant 2 : i32
    %0 = arith.muli %arg0, %c2_i32 : i32
    %1 = arith.addi %0, %arg1 : i32
    %c0_i32 = arith.constant 0 : i32
    %c0_i32_0 = arith.constant 0 : i32
    return %1, %c0_i32 : i32, i32
  }
  func.func @transform_8(%arg0: i32, %arg1: i32) -> (i32, i32) {
    %c2_i32 = arith.constant 2 : i32
    %0 = arith.muli %arg0, %c2_i32 : i32
    %1 = arith.addi %0, %arg1 : i32
    %c0_i32 = arith.constant 0 : i32
    %c0_i32_0 = arith.constant 0 : i32
    return %1, %c0_i32 : i32, i32
  }
  func.func @transform_9(%arg0: i32, %arg1: i32) -> (i32, i32, i32) {
    %c0_i32 = arith.constant 0 : i32
    %c0_i32_0 = arith.constant 0 : i32
    %c0_i32_1 = arith.constant 0 : i32
    return %arg0, %c0_i32, %c0_i32_0 : i32, i32, i32
  }
  func.func @transform_10(%arg0: i32, %arg1: i32) -> (i32, i32, i32) {
    %c0_i32 = arith.constant 0 : i32
    %c0_i32_0 = arith.constant 0 : i32
    %c0_i32_1 = arith.constant 0 : i32
    return %arg0, %c0_i32, %c0_i32_0 : i32, i32, i32
  }
}

</mosaic_0001>

<bundles_post_ra>
// kernel: tpu_custom_call.1
= control target key start
LH: loop header
LB: loop body
LE: loop exit
PB: predicated region body
PF: predicated region fallthrough
CT: control target
= control target key end

     0   :  { %s2728_s0 = inlined_call_operand.vmem [shape: f32[128,128], index: 0, kind: input, shape index: {}]   ;;  %s2729_s1 = inlined_call_operand.vmem [shape: f32[128,128], index: 1, kind: input, shape index: {}]   ;;  %s2730_s2 = inlined_call_operand.hbm [shape: f32[128,128], index: 2, kind: input, shape index: {}]   ;;  %s2731_s3 = inlined_call_operand.vmem [shape: f32[1,128], index: 3, kind: input, shape index: {}]   ;;  %s2732_s4 = inlined_call_operand.hbm [shape: f32[128,128], index: 4, kind: input, shape index: {}]   ;;  %s2733_s5 = inlined_call_operand.vmem [shape: f32[1,128], index: 5, kind: input, shape index: {}]   ;;  %s2734_s6 = inlined_call_operand.vmem [shape: s32[128,128], index: 6, kind: input, shape index: {}]   ;;  %s2735_s7 = inlined_call_operand.vmem [shape: s32[128,128], index: 7, kind: input, shape index: {}]   ;;  %s2736_s8 = inlined_call_operand.vmem [shape: f32[128,1], index: 8, kind: output, shape index: {0}]   ;;  %s2737_s9 = inlined_call_operand.hbm [shape: f32[2,8,128], index: 9, kind: output, shape index: {1}]   ;;  %s2738_s10 = inlined_call_operand.hbm [shape: f32[2,8,128], index: 10, kind: output, shape index: {2}]  }
   0x1   :  { %2746 = sst [smem:[#allocation22_spill]] %s2730_s2 }
   0x2   :  { %2747 = sst [smem:[#allocation23_spill]] %s2732_s4 }
   0x3   :  { %16 = vsyncpa [#allocation4], 0 }
   0x4   :  { %17 = vsyncpa [#allocation7], 0 }
   0x5   :  { %18 = vsyncpa [#allocation5], 0 }
   0x6   :  { %20 = vsyncpa [#allocation5 + $0x1], 0 }
   0x7   :  { %21 = vsyncpa [#allocation10], 0 }
   0x8   :  { %23 = vsyncpa [#allocation10 + $0x1], 0  ;;  %s2283_s13 = smov 0   ;;  %s2285_s14 = smov 0  }
   0x9   :  { %s2287_s15 = smov 0   ;;  %s2289_s16 = smov 0  }
   0xa   :  { %s2291_s17 = smov 0   ;;  %s2293_s18 = smov 0  }
   0xb   :  { %s2295_s19 = smov 0   ;;  %s2297_s20 = smov 0  }
   0xc LB: > { %2748 = sst [smem:[#allocation15_spill]] %s2193_s13  ;;  %s1634_s21 = sadd.s32 4294967295, %s2221_s20   ;;  %s2221_s20 = sphi %s2297_s20, %s29_s20   ;;  %s2217_s19 = sphi %s2295_s19, %s2769_s19   ;;  %s2213_s18 = sphi %s2293_s18, %s2768_s18   ;;  %s2209_s17 = sphi %s2291_s17, %s2767_s17   ;;  %s2205_s16 = sphi %s2289_s16, %s2766_s16   ;;  %s2201_s15 = sphi %s2287_s15, %s2772_s15   ;;  %s2197_s14 = sphi %s2285_s14, %s2771_s14   ;;  %s2193_s13 = sphi %s2283_s13, %s2770_s13  }
   0xd   : > { %2749 = sst [smem:[#allocation16_spill]] %s2213_s18  ;;  %s1635_s22 = sadd.s32 4294967294, %s2221_s20  }
   0xe   : > { %2750 = sst [smem:[#allocation17_spill]] %s2217_s19  ;;  %s38_s23 = sadd.s32 1, %s2213_s18 }
   0xf   : > { %2751 = sst [smem:[#allocation18_spill]] %s2221_s20  ;;  %s41_s24 = sadd.s32 1, %s2217_s19 }
  0x10   : > { %p39_p0 = scmp.ge.s32.totalorder %s38_s23, 2  ;;  %s273_s25 = sadd.s32 1, %s2201_s15 }
  0x11   : > { %p283_p1 = scmp.ne.s32.totalorder %s2201_s15, %s2197_s14  ;;  %p284_p2 = scmp.eq.s32.totalorder %s1634_s21, 3 }
  0x12   : > { %s2774_s23 = smov (%p39_p0, %s38_s23), 0  ;;  %s2776_s24 = smov (!%p39_p0, %s41_s24), %s2217_s19 }
  0x13   : > { %2752 = sst [smem:[#allocation19_spill]] %s2774_s23  ;;  %p2333_p3 = por %p284_p2, %p283_p1 }
  0x14   : > { %p289_p4 = scmp.ne.s32.totalorder %s2197_s14, %s2193_s13  ;;  %p43_p5 = scmp.ge.s32.totalorder %s2776_s24, 2 }
  0x15   : > { %p290_p6 = scmp.eq.s32.totalorder %s1635_s22, 3  ;;  %p1644_p7 = scmp.ge.s32.totalorder %s2221_s20, 1 }
  0x16   : > { %p323_p8 = scmp.lt.s32.totalorder %s2221_s20, 5  ;;  %s2778_s24 = smov (%p43_p5, %s2776_s24), 0 }
  0x17   : > { %2754 = sst [smem:[#allocation20_spill]] %s2778_s24  ;;  %p2343_p9 = por %p290_p6, %p289_p4 }
  0x18   : > { %p2347_p10 = pnand %p1644_p7, %p323_p8  ;;  %s270_s29 = ssub.s32 %s2217_s19, %s2778_s24 }
  0x19   : > { %s2755_s27 = scalar_select %p2343_p9, 1, 0 }
  0x1a   : > { %p271_p11 = scmp.eq.s32.totalorder %s270_s29, 0  ;;  %p1831_p12 = pneg %p2347_p10 }
  0x1b   : > { %2756 = sst [smem:[#allocation21_spill]] %s2755_s27  ;;  %p2355_p13 = scmp.eq.s32.totalorder %s1634_s21, 0 }
  0x1c   : > { %s2759_s2 = sld [smem:[#allocation22_spill]]  ;;  %s2223_s18 = smov [#allocation3]  }
  0x1d   : > { %s2363_s23 = scalar_select %p271_p11, %s2201_s15, %s273_s25  }
  0x1e   : > { %s339_s27 = sshll.u32 %s2223_s18, 4  ;;  %p1832_p0 = pnand %p2355_p13, %p1831_p12  ;;  %s340_s27 = int_to_ptr.vmem [resolvable:$true] %s339_s27 }
  0x1f   : > { %s2224_s29 = smov 128   ;;  %s2225_s24 = smov 8  }
  0x20   : > { %s2760_s4 = sld [smem:[#allocation23_spill]]  ;;  %s2226_s20 = smov [#allocation6]  }
  0x21   : > { %s356_s11 = sshll.u32 %s2226_s20, 4  ;;  %s357_s11 = int_to_ptr.vmem [resolvable:$true] %s356_s11 }
  0x22   : > { %s337_s22 = sshll.u32 %s2759_s2, 4  ;;  %s338_s22 = int_to_ptr.hbm [resolvable:$true] %s337_s22 }
  0x23   : > { %1834 = dma.hbm_to_vmem [thread:$0]  (!%p1832_p0), %s338_s22, 2048, %s340_s27, [#allocation4], %s2224_s29, %s2224_s29, %s2225_s24  }
  0x24   : > { %414 = sbr.rel (%p2347_p10) target bundleno = 1314 (0x522), region = 52 }
  0x26   : > { %s354_s13 = sshll.u32 %s2760_s4, 4  ;;  %s355_s13 = int_to_ptr.hbm [resolvable:$true] %s354_s13 }
  0x27   : > { %1837 = dma.hbm_to_vmem [thread:$0]  (!%p1832_p0), %s355_s13, 2048, %s357_s11, [#allocation7], %s2224_s29, %s2224_s29, %s2225_s24  }
  0x29   : > { %2176 = dma.done.wait (%p2355_p13), [#allocation4], 2048  }
  0x2a   : > { %2178 = vsyncadd (%p2355_p13), [#allocation4], 4294965248 }
  0x2b   : > { %2180 = dma.done.wait (%p2355_p13), [#allocation7], 2048  }
  0x2c   : > { %2182 = vsyncadd (%p2355_p13), [#allocation7], 4294965248  ;;  %s2381_s18 = sand.u32 1, %s2197_s14   ;;  %s1653_s13 = sshll.u32 %s2209_s17, 1 }
  0x2d   : > { %s1651_s19 = sshll.u32 %s2381_s18, 3  ;;  %s487_s20 = sadd.s32 %s2205_s16, %s1653_s13 }
  0x2e   : > { %s1654_s24 = sshll.u32 %s487_s20, 2  ;;  %s2408_s27 = scalar_lea.vmem [#allocation9], %s1651_s19 }
  0x2f   : > { %p489_p1 = scmp.lt.s32.totalorder %s1654_s24, 15  ;;  %p1665_p2 = scmp.ne.s32.totalorder %s2205_s16, 0 }
  0x31   : > { %s2780_s24 = smov (!%p489_p1, %s1654_s24), 15  ;;  %529 = sbr.rel (%p1665_p2) target bundleno = 563 (0x233), region = 64 }
  0x32   : > { %s1655_s25 = sshll.u32 %s2780_s24, 3  ;;  %s2406_s24 = scalar_lea.vmem [#allocation8], %s1651_s19 }
  0x33   : > { %s2389_s12 = scalar_lea.vmem %s2728_s0, %s1655_s25  ;;  %s2394_s29 = scalar_lea.vmem %s2734_s6, %s1655_s25 }
  0x34   : > { %s2399_s2 = scalar_lea.vmem %s2735_s7, %s1655_s25  ;;  %s2404_s4 = scalar_lea.vmem %s2736_s8, %s1655_s25 }
  0x36   : > { %v561_v0 = vld [vmem:[#allocation3 + $0x78] sm:$0xff]  ;;  %v560_v1 = vld [vmem:[#allocation3 + $0x70] sm:$0xff]  ;;  %v559_v2 = vld [vmem:[#allocation3 + $0x68] sm:$0xff] }
  0x37   : > { %566 = vmatpush.msra.mxu0 %v561_v0  ;;  %1779 = vmatpush.msra.mxu2 %v561_v0  ;;  %v558_v3 = vld [vmem:[#allocation3 + $0x60] sm:$0xff]  ;;  %v557_v4 = vld [vmem:[#allocation3 + $0x58] sm:$0xff]  ;;  %v556_v5 = vld [vmem:[#allocation3 + $0x50] sm:$0xff] }
  0x38   : > { %v555_v6 = vld [vmem:[#allocation3 + $0x48] sm:$0xff]  ;;  %v554_v7 = vld [vmem:[#allocation3 + $0x40] sm:$0xff]  ;;  %v553_v8 = vld [vmem:[#allocation3 + $0x38] sm:$0xff] }
  0x39   : > { %567 = vmatpush.msra.mxu0 %v560_v1  ;;  %1780 = vmatpush.msra.mxu2 %v560_v1  ;;  %v552_v9 = vld [vmem:[#allocation3 + $0x30] sm:$0xff]  ;;  %v551_v10 = vld [vmem:[#allocation3 + $0x28] sm:$0xff]  ;;  %v550_v11 = vld [vmem:[#allocation3 + $0x20] sm:$0xff] }
  0x3a   : > { %v549_v12 = vld [vmem:[#allocation3 + $0x18] sm:$0xff]  ;;  %v548_v13 = vld [vmem:[#allocation3 + $0x10] sm:$0xff]  ;;  %v547_v14 = vld [vmem:[#allocation3 + $0x8] sm:$0xff] }
  0x3b   : > { %568 = vmatpush.msra.mxu0 %v559_v2  ;;  %1781 = vmatpush.msra.mxu2 %v559_v2  ;;  %v546_v15 = vld [vmem:[#allocation3] sm:$0xff]  ;;  %v531_v18 = vld [vmem:[%s2729_s1 + $0x8] sm:$0xff]  ;;  %v532_v20 = vld [vmem:[%s2729_s1 + $0x10] sm:$0xff] }
  0x3c   : > { %v530_v16 = vld [vmem:[%s2729_s1] sm:$0xff]  ;;  %v539_v19 = vld [vmem:[%s2729_s1 + $0x48] sm:$0xff]  ;;  %v540_v21 = vld [vmem:[%s2729_s1 + $0x50] sm:$0xff] }
  0x3d   : > { %569 = vmatpush.msra.mxu0 %v558_v3  ;;  %1782 = vmatpush.msra.mxu2 %v558_v3  ;;  %v538_v17 = vld [vmem:[%s2729_s1 + $0x40] sm:$0xff]  ;;  %v533_v22 = vld [vmem:[%s2729_s1 + $0x18] sm:$0xff]  ;;  %v725_v25 = vld [vmem:[#allocation6 + $0x70] sm:$0xff] }
  0x3e   : > { %v541_v23 = vld [vmem:[%s2729_s1 + $0x58] sm:$0xff]  ;;  %v724_v26 = vld [vmem:[#allocation6 + $0x68] sm:$0xff]  ;;  %v723_v27 = vld [vmem:[#allocation6 + $0x60] sm:$0xff] }
  0x3f   : > { %570 = vmatpush.msra.mxu0 %v557_v4  ;;  %1783 = vmatpush.msra.mxu2 %v557_v4  ;;  %v726_v24 = vld [vmem:[#allocation6 + $0x78] sm:$0xff]  ;;  %v534_v28 = vld [vmem:[%s2729_s1 + $0x20] sm:$0xff]  ;;  %v721_v31 = vld [vmem:[#allocation6 + $0x50] sm:$0xff] }
  0x40   : > { %731 = vmatpush.msra.mxu1 %v726_v24  ;;  %1795 = vmatpush.msra.mxu3 %v726_v24  ;;  %v542_v29 = vld [vmem:[%s2729_s1 + $0x60] sm:$0xff]  ;;  %v722_v30 = vld [vmem:[#allocation6 + $0x58] sm:$0xff]  ;;  %v720_v32 = vld [vmem:[#allocation6 + $0x48] sm:$0xff] }
  0x41   : > { %571 = vmatpush.msra.mxu0 %v556_v5  ;;  %1784 = vmatpush.msra.mxu2 %v556_v5  ;;  %v719_v33 = vld [vmem:[#allocation6 + $0x40] sm:$0xff]  ;;  %v535_v34 = vld [vmem:[%s2729_s1 + $0x28] sm:$0xff]  ;;  %v536_v36 = vld [vmem:[%s2729_s1 + $0x30] sm:$0xff] }
  0x42   : > { %732 = vmatpush.msra.mxu1 %v725_v25  ;;  %1796 = vmatpush.msra.mxu3 %v725_v25  ;;  %v543_v35 = vld [vmem:[%s2729_s1 + $0x68] sm:$0xff]  ;;  %v544_v37 = vld [vmem:[%s2729_s1 + $0x70] sm:$0xff]  ;;  %v537_v38 = vld [vmem:[%s2729_s1 + $0x38] sm:$0xff] }
  0x43   : > { %572 = vmatpush.msra.mxu0 %v555_v6  ;;  %1785 = vmatpush.msra.mxu2 %v555_v6  ;;  %v545_v39 = vld [vmem:[%s2729_s1 + $0x78] sm:$0xff]  ;;  %v717_v41 = vld [vmem:[#allocation6 + $0x30] sm:$0xff]  ;;  %v716_v42 = vld [vmem:[#allocation6 + $0x28] sm:$0xff] }
  0x44   : > { %733 = vmatpush.msra.mxu1 %v724_v26  ;;  %1797 = vmatpush.msra.mxu3 %v724_v26  ;;  %v718_v40 = vld [vmem:[#allocation6 + $0x38] sm:$0xff]  ;;  %v715_v43 = vld [vmem:[#allocation6 + $0x20] sm:$0xff]  ;;  %v713_v45 = vld [vmem:[#allocation6 + $0x10] sm:$0xff] }
  0x45   : > { %573 = vmatpush.msra.mxu0 %v554_v7  ;;  %1786 = vmatpush.msra.mxu2 %v554_v7  ;;  %v714_v44 = vld [vmem:[#allocation6 + $0x18] sm:$0xff]  ;;  %v712_v46 = vld [vmem:[#allocation6 + $0x8] sm:$0xff]  ;;  %v711_v47 = vld [vmem:[#allocation6] sm:$0xff] }
  0x46   : > { %734 = vmatpush.msra.mxu1 %v723_v27  ;;  %1798 = vmatpush.msra.mxu3 %v723_v27  ;;  %v2462_v48 = vld [vmem:[%s2731_s3] ss:$0 sm:$0xff] }
  0x47   : > { %574 = vmatpush.msra.mxu0 %v553_v8  ;;  %1787 = vmatpush.msra.mxu2 %v553_v8 }
  0x48   : > { %735 = vmatpush.msra.mxu1 %v722_v30  ;;  %1799 = vmatpush.msra.mxu3 %v722_v30 }
  0x49   : > { %575 = vmatpush.msra.mxu0 %v552_v9  ;;  %1788 = vmatpush.msra.mxu2 %v552_v9 }
  0x4a   : > { %736 = vmatpush.msra.mxu1 %v721_v31  ;;  %1800 = vmatpush.msra.mxu3 %v721_v31 }
  0x4b   : > { %576 = vmatpush.msra.mxu0 %v551_v10  ;;  %1789 = vmatpush.msra.mxu2 %v551_v10 }
  0x4c   : > { %737 = vmatpush.msra.mxu1 %v720_v32  ;;  %1801 = vmatpush.msra.mxu3 %v720_v32 }
  0x4d   : > { %577 = vmatpush.msra.mxu0 %v550_v11  ;;  %1790 = vmatpush.msra.mxu2 %v550_v11 }
  0x4e   : > { %738 = vmatpush.msra.mxu1 %v719_v33  ;;  %1802 = vmatpush.msra.mxu3 %v719_v33 }
  0x4f   : > { %578 = vmatpush.msra.mxu0 %v549_v12  ;;  %1791 = vmatpush.msra.mxu2 %v549_v12 }
  0x50   : > { %739 = vmatpush.msra.mxu1 %v718_v40  ;;  %1803 = vmatpush.msra.mxu3 %v718_v40 }
  0x51   : > { %579 = vmatpush.msra.mxu0 %v548_v13  ;;  %1792 = vmatpush.msra.mxu2 %v548_v13 }
  0x52   : > { %740 = vmatpush.msra.mxu1 %v717_v41  ;;  %1804 = vmatpush.msra.mxu3 %v717_v41 }
  0x53   : > { %580 = vmatpush.msra.mxu0 %v547_v14  ;;  %1793 = vmatpush.msra.mxu2 %v547_v14 }
  0x54   : > { %741 = vmatpush.msra.mxu1 %v716_v42  ;;  %1805 = vmatpush.msra.mxu3 %v716_v42 }
  0x55   : > { %581 = vmatpush.msra.mxu0 %v546_v15  ;;  %1794 = vmatpush.msra.mxu2 %v546_v15 }
  0x56   : > { %582 = vmatmul.f32.vlgmr.msra.gmra.mxu0 %v530_v16  ;;  %606 = vmatmul.f32.vlgmr.msra.gmra.mxu2 %v538_v17 }
  0x57   : > { %742 = vmatpush.msra.mxu1 %v715_v43  ;;  %1806 = vmatpush.msra.mxu3 %v715_v43 }
  0x59   : > { %743 = vmatpush.msra.mxu1 %v714_v44  ;;  %1807 = vmatpush.msra.mxu3 %v714_v44 }
  0x5b   : > { %744 = vmatpush.msra.mxu1 %v713_v45  ;;  %1808 = vmatpush.msra.mxu3 %v713_v45 }
  0x5d   : > { %745 = vmatpush.msra.mxu1 %v712_v46  ;;  %1809 = vmatpush.msra.mxu3 %v712_v46 }
  0x5e   : > { %585 = vmatmul.f32.gmra.mxu0 %v531_v18  ;;  %609 = vmatmul.f32.gmra.mxu2 %v539_v19 }
  0x5f   : > { %746 = vmatpush.msra.mxu1 %v711_v47  ;;  %1810 = vmatpush.msra.mxu3 %v711_v47 }
  0x66   : > { %588 = vmatmul.f32.gmra.mxu0 %v532_v20  ;;  %612 = vmatmul.f32.gmra.mxu2 %v540_v21 }
  0x6e   : > { %591 = vmatmul.f32.gmra.mxu0 %v533_v22  ;;  %615 = vmatmul.f32.gmra.mxu2 %v541_v23 }
  0x76   : > { %594 = vmatmul.f32.gmra.mxu0 %v534_v28  ;;  %618 = vmatmul.f32.gmra.mxu2 %v542_v29 }
  0x7e   : > { %597 = vmatmul.f32.gmra.mxu0 %v535_v34  ;;  %621 = vmatmul.f32.gmra.mxu2 %v543_v35 }
  0x86   : > { %600 = vmatmul.f32.gmra.mxu0 %v536_v36  ;;  %624 = vmatmul.f32.gmra.mxu2 %v544_v37 }
  0x8e   : > { %603 = vmatmul.f32.gmra.mxu0 %v537_v38  ;;  %627 = vmatmul.f32.gmra.mxu2 %v545_v39 }
  0xd3   : > { %v583_v49 = vpop.f32.mrf.mxu0 }
  0xd4   : > { %v584_v50 = vadd.f32 %v2462_v48, %v583_v49 }
  0xd6   : > { %v647_v51 = vmul.f32 1.442695, %v584_v50  ;;  %vm631_vm0 = vcmp.gt.f32.partialorder %v584_v50, 0.0 }
  0xd8   : > { %1921 = vpow2.f32 %v647_v51 }
  0xd9   : > { %v607_v52 = vpop.f32.mrf.mxu2 }
  0xda   : > { %v608_v53 = vadd.f32 %v2462_v48, %v607_v52 }
  0xdb   : > { %v586_v54 = vpop.f32.mrf.mxu0 }
  0xdc   : > { %v663_v55 = vmul.f32 1.442695, %v608_v53  ;;  %v587_v56 = vadd.f32 %v2462_v48, %v586_v54  ;;  %vm639_vm1 = vcmp.gt.f32.partialorder %v608_v53, 0.0 }
  0xde   : > { %v1922_v57 = vpop.eup %1921  ;;  %1923 = vpow2.f32 %v663_v55  ;;  %v649_v58 = vmul.f32 1.442695, %v587_v56  ;;  %vm632_vm2 = vcmp.gt.f32.partialorder %v587_v56, 0.0 }
  0xdf   : > { %v1666_v59 = vadd.f32 -1.0, %v1922_v57 }
  0xe0   : > { %1925 = vpow2.f32 %v649_v58 }
  0xe1   : > { %v610_v60 = vpop.f32.mrf.mxu2  ;;  %v695_v61 = vsel %vm631_vm0, %v584_v50, %v1666_v59 }
  0xe2   : > { %v611_v62 = vadd.f32 %v2462_v48, %v610_v60  ;;  %747 = vmatmul.f32.vlgmr.msra.gmra.mxu1 %v695_v61 }
  0xe3   : > { %v589_v63 = vpop.f32.mrf.mxu0 }
  0xe4   : > { %v1924_v0 = vpop.eup %1923  ;;  %v665_v1 = vmul.f32 1.442695, %v611_v62  ;;  %v590_v2 = vadd.f32 %v2462_v48, %v589_v63  ;;  %vm640_vm3 = vcmp.gt.f32.partialorder %v611_v62, 0.0 }
  0xe5   : > { %v1674_v3 = vadd.f32 -1.0, %v1924_v0 }
  0xe6   : > { %v1926_v4 = vpop.eup %1925  ;;  %1927 = vpow2.f32 %v665_v1  ;;  %v651_v5 = vmul.f32 1.442695, %v590_v2  ;;  %vm633_vm4 = vcmp.gt.f32.partialorder %v590_v2, 0.0 }
  0xe7   : > { %v703_v6 = vsel %vm639_vm1, %v608_v53, %v1674_v3  ;;  %v1667_v7 = vadd.f32 -1.0, %v1926_v4 }
  0xe8   : > { %1929 = vpow2.f32 %v651_v5  ;;  %771 = vmatmul.f32.vlgmr.msra.gmra.mxu3 %v703_v6 }
  0xe9   : > { %v613_v8 = vpop.f32.mrf.mxu2  ;;  %v696_v9 = vsel %vm632_vm2, %v587_v56, %v1667_v7 }
  0xea   : > { %v614_v10 = vadd.f32 %v2462_v48, %v613_v8  ;;  %750 = vmatmul.f32.gmra.mxu1 %v696_v9 }
  0xeb   : > { %v592_v11 = vpop.f32.mrf.mxu0 }
  0xec   : > { %v1928_v12 = vpop.eup %1927  ;;  %v667_v13 = vmul.f32 1.442695, %v614_v10  ;;  %v593_v14 = vadd.f32 %v2462_v48, %v592_v11  ;;  %vm641_vm5 = vcmp.gt.f32.partialorder %v614_v10, 0.0 }
  0xed   : > { %v1675_v15 = vadd.f32 -1.0, %v1928_v12 }
  0xee   : > { %v1930_v16 = vpop.eup %1929  ;;  %1931 = vpow2.f32 %v667_v13  ;;  %v653_v17 = vmul.f32 1.442695, %v593_v14  ;;  %vm634_vm6 = vcmp.gt.f32.partialorder %v593_v14, 0.0 }
  0xef   : > { %v704_v18 = vsel %vm640_vm3, %v611_v62, %v1675_v15  ;;  %v1668_v19 = vadd.f32 -1.0, %v1930_v16 }
  0xf0   : > { %1933 = vpow2.f32 %v653_v17  ;;  %774 = vmatmul.f32.gmra.mxu3 %v704_v18 }
  0xf1   : > { %v616_v20 = vpop.f32.mrf.mxu2  ;;  %v697_v21 = vsel %vm633_vm4, %v590_v2, %v1668_v19 }
  0xf2   : > { %v617_v22 = vadd.f32 %v2462_v48, %v616_v20  ;;  %753 = vmatmul.f32.gmra.mxu1 %v697_v21 }
  0xf3   : > { %v595_v23 = vpop.f32.mrf.mxu0 }
  0xf4   : > { %v1932_v24 = vpop.eup %1931  ;;  %v669_v25 = vmul.f32 1.442695, %v617_v22  ;;  %v596_v26 = vadd.f32 %v2462_v48, %v595_v23  ;;  %vm642_vm7 = vcmp.gt.f32.partialorder %v617_v22, 0.0 }
  0xf5   : > { %v1676_v27 = vadd.f32 -1.0, %v1932_v24 }
  0xf6   : > { %v1934_v28 = vpop.eup %1933  ;;  %1935 = vpow2.f32 %v669_v25  ;;  %v655_v29 = vmul.f32 1.442695, %v596_v26  ;;  %vm635_vm8 = vcmp.gt.f32.partialorder %v596_v26, 0.0 }
  0xf7   : > { %v705_v30 = vsel %vm641_vm5, %v614_v10, %v1676_v27  ;;  %v1669_v31 = vadd.f32 -1.0, %v1934_v28 }
  0xf8   : > { %1937 = vpow2.f32 %v655_v29  ;;  %777 = vmatmul.f32.gmra.mxu3 %v705_v30 }
  0xf9   : > { %v619_v32 = vpop.f32.mrf.mxu2  ;;  %v698_v33 = vsel %vm634_vm6, %v593_v14, %v1669_v31 }
  0xfa   : > { %v620_v34 = vadd.f32 %v2462_v48, %v619_v32  ;;  %756 = vmatmul.f32.gmra.mxu1 %v698_v33 }
  0xfb   : > { %v598_v35 = vpop.f32.mrf.mxu0 }
  0xfc   : > { %v1936_v36 = vpop.eup %1935  ;;  %v671_v37 = vmul.f32 1.442695, %v620_v34  ;;  %v599_v38 = vadd.f32 %v2462_v48, %v598_v35  ;;  %vm643_vm9 = vcmp.gt.f32.partialorder %v620_v34, 0.0 }
  0xfd   : > { %v1677_v39 = vadd.f32 -1.0, %v1936_v36 }
  0xfe   : > { %v1938_v40 = vpop.eup %1937  ;;  %1939 = vpow2.f32 %v671_v37  ;;  %v657_v41 = vmul.f32 1.442695, %v599_v38  ;;  %vm636_vm10 = vcmp.gt.f32.partialorder %v599_v38, 0.0 }
  0xff   : > { %v706_v42 = vsel %vm642_vm7, %v617_v22, %v1677_v39  ;;  %v1670_v43 = vadd.f32 -1.0, %v1938_v40 }
 0x100   : > { %1941 = vpow2.f32 %v657_v41  ;;  %780 = vmatmul.f32.gmra.mxu3 %v706_v42 }
 0x101   : > { %v622_v44 = vpop.f32.mrf.mxu2  ;;  %v699_v45 = vsel %vm635_vm8, %v596_v26, %v1670_v43 }
 0x102   : > { %v623_v46 = vadd.f32 %v2462_v48, %v622_v44  ;;  %759 = vmatmul.f32.gmra.mxu1 %v699_v45 }
 0x103   : > { %v601_v47 = vpop.f32.mrf.mxu0 }
 0x104   : > { %v1940_v49 = vpop.eup %1939  ;;  %v673_v50 = vmul.f32 1.442695, %v623_v46  ;;  %v602_v51 = vadd.f32 %v2462_v48, %v601_v47  ;;  %vm644_vm11 = vcmp.gt.f32.partialorder %v623_v46, 0.0 }
 0x105   : > { %v1678_v52 = vadd.f32 -1.0, %v1940_v49 }
 0x106   : > { %v1942_v53 = vpop.eup %1941  ;;  %1943 = vpow2.f32 %v673_v50  ;;  %v659_v54 = vmul.f32 1.442695, %v602_v51  ;;  %vm637_vm12 = vcmp.gt.f32.partialorder %v602_v51, 0.0 }
 0x107   : > { %v707_v55 = vsel %vm643_vm9, %v620_v34, %v1678_v52  ;;  %v1671_v56 = vadd.f32 -1.0, %v1942_v53 }
 0x108   : > { %1945 = vpow2.f32 %v659_v54  ;;  %783 = vmatmul.f32.gmra.mxu3 %v707_v55 }
 0x109   : > { %v625_v57 = vpop.f32.mrf.mxu2  ;;  %v700_v58 = vsel %vm636_vm10, %v599_v38, %v1671_v56 }
 0x10a   : > { %v626_v59 = vadd.f32 %v2462_v48, %v625_v57  ;;  %762 = vmatmul.f32.gmra.mxu1 %v700_v58 }
 0x10b   : > { %v604_v60 = vpop.f32.mrf.mxu0 }
 0x10c   : > { %v1944_v61 = vpop.eup %1943  ;;  %v675_v62 = vmul.f32 1.442695, %v626_v59  ;;  %v605_v63 = vadd.f32 %v2462_v48, %v604_v60  ;;  %vm645_vm13 = vcmp.gt.f32.partialorder %v626_v59, 0.0 }
 0x10d   : > { %v1679_v0 = vadd.f32 -1.0, %v1944_v61 }
 0x10e   : > { %v1946_v1 = vpop.eup %1945  ;;  %1947 = vpow2.f32 %v675_v62  ;;  %v661_v2 = vmul.f32 1.442695, %v605_v63  ;;  %vm638_vm14 = vcmp.gt.f32.partialorder %v605_v63, 0.0 }
 0x10f   : > { %v708_v3 = vsel %vm644_vm11, %v623_v46, %v1679_v0  ;;  %v1672_v4 = vadd.f32 -1.0, %v1946_v1 }
 0x110   : > { %1949 = vpow2.f32 %v661_v2  ;;  %786 = vmatmul.f32.gmra.mxu3 %v708_v3 }
 0x111   : > { %v628_v5 = vpop.f32.mrf.mxu2  ;;  %v701_v6 = vsel %vm637_vm12, %v602_v51, %v1672_v4 }
 0x112   : > { %v629_v7 = vadd.f32 %v2462_v48, %v628_v5  ;;  %765 = vmatmul.f32.gmra.mxu1 %v701_v6  ;;  %v1920_v48 = vld [vmem:[%s2733_s5] ss:$0 sm:$0xff] }
 0x114   : > { %v1948_v8 = vpop.eup %1947  ;;  %v677_v9 = vmul.f32 1.442695, %v629_v7  ;;  %vm646_vm15 = vcmp.gt.f32.partialorder %v629_v7, 0.0 }
 0x115   : > { %v1680_v10 = vadd.f32 -1.0, %v1948_v8 }
 0x116   : > { %v1950_v11 = vpop.eup %1949  ;;  %1951 = vpow2.f32 %v677_v9 }
 0x117   : > { %v709_v12 = vsel %vm645_vm13, %v626_v59, %v1680_v10  ;;  %v1673_v13 = vadd.f32 -1.0, %v1950_v11 }
 0x118   : > { %789 = vmatmul.f32.gmra.mxu3 %v709_v12 }
 0x119   : > { %v702_v14 = vsel %vm638_vm14, %v605_v63, %v1673_v13 }
 0x11a   : > { %768 = vmatmul.f32.gmra.mxu1 %v702_v14 }
 0x11c   : > { %v1952_v15 = vpop.eup %1951 }
 0x11d   : > { %v1681_v16 = vadd.f32 -1.0, %v1952_v15 }
 0x11f   : > { %v710_v17 = vsel %vm646_vm15, %v629_v7, %v1681_v16 }
 0x120   : > { %792 = vmatmul.f32.gmra.mxu3 %v710_v17 }
 0x15f   : > { %v748_v18 = vpop.f32.mrf.mxu1 }
 0x160   : > { %v2483_v19 = vadd.f32 %v1920_v48, %v748_v18 }
 0x162   : > { %v796_v20 = vmul.f32 %v2483_v19, %v2483_v19 }
 0x164   : > { %812 = vadd.xlane.f32.xlu0 %v796_v20 }
 0x167   : > { %v751_v21 = vpop.f32.mrf.mxu1 }
 0x168   : > { %v2487_v22 = vadd.f32 %v1920_v48, %v751_v21 }
 0x16a   : > { %v797_v23 = vmul.f32 %v2487_v22, %v2487_v22 }
 0x16b   : > { %v772_v24 = vpop.f32.mrf.mxu3 }
 0x16c   : > { %v2491_v25 = vadd.f32 %v1920_v48, %v772_v24  ;;  %814 = vadd.xlane.f32.xlu0 %v797_v23 }
 0x16e   : > { %v804_v26 = vmul.f32 %v2491_v25, %v2491_v25 }
 0x16f   : > { %v754_v27 = vpop.f32.mrf.mxu1 }
 0x170   : > { %v2495_v28 = vadd.f32 %v1920_v48, %v754_v27  ;;  %828 = vadd.xlane.f32.xlu2 %v804_v26 }
 0x172   : > { %v798_v29 = vmul.f32 %v2495_v28, %v2495_v28 }
 0x173   : > { %v775_v30 = vpop.f32.mrf.mxu3 }
 0x174   : > { %v2499_v31 = vadd.f32 %v1920_v48, %v775_v30  ;;  %816 = vadd.xlane.f32.xlu1 %v798_v29 }
 0x176   : > { %v805_v32 = vmul.f32 %v2499_v31, %v2499_v31 }
 0x177   : > { %v757_v33 = vpop.f32.mrf.mxu1 }
 0x178   : > { %v2503_v34 = vadd.f32 %v1920_v48, %v757_v33  ;;  %830 = vadd.xlane.f32.xlu0 %v805_v32 }
 0x17a   : > { %v799_v35 = vmul.f32 %v2503_v34, %v2503_v34 }
 0x17b   : > { %v778_v36 = vpop.f32.mrf.mxu3 }
 0x17c   : > { %818 = vadd.xlane.f32.xlu1 %v799_v35  ;;  %v2507_v37 = vadd.f32 %v1920_v48, %v778_v36 }
 0x17e   : > { %v806_v41 = vmul.f32 %v2507_v37, %v2507_v37 }
 0x17f   : > { %v760_v38 = vpop.f32.mrf.mxu1 }
 0x180   : > { %v2509_v39 = vadd.f32 %v1920_v48, %v760_v38 }
 0x182   : > { %v800_v40 = vmul.f32 %v2509_v39, %v2509_v39 }
 0x183   : > { %v781_v42 = vpop.f32.mrf.mxu3 }
 0x184   : > { %820 = vadd.xlane.f32.xlu2 %v800_v40  ;;  %832 = vadd.xlane.f32.xlu1 %v806_v41  ;;  %v2515_v43 = vadd.f32 %v1920_v48, %v781_v42 }
 0x186   : > { %v807_v45 = vmul.f32 %v2515_v43, %v2515_v43 }
 0x187   : > { %v763_v44 = vpop.f32.mrf.mxu1 }
 0x188   : > { %v2521_v49 = vadd.f32 %v1920_v48, %v763_v44 }
 0x18a   : > { %v801_v53 = vmul.f32 %v2521_v49, %v2521_v49 }
 0x18b   : > { %v784_v46 = vpop.f32.mrf.mxu3 }
 0x18c   : > { %v2519_v47 = vadd.f32 %v1920_v48, %v784_v46  ;;  %834 = vadd.xlane.f32.xlu2 %v807_v45 }
 0x18e   : > { %v808_v50 = vmul.f32 %v2519_v47, %v2519_v47 }
 0x18f   : > { %v766_v51 = vpop.f32.mrf.mxu1 }
 0x190   : > { %836 = vadd.xlane.f32.xlu0 %v808_v50  ;;  %v2525_v52 = vadd.f32 %v1920_v48, %v766_v51 }
 0x192   : > { %v802_v55 = vmul.f32 %v2525_v52, %v2525_v52 }
 0x193   : > { %v787_v54 = vpop.f32.mrf.mxu3 }
 0x194   : > { %822 = vadd.xlane.f32.xlu2 %v801_v53  ;;  %v2537_v61 = vadd.f32 %v1920_v48, %v787_v54 }
 0x196   : > { %v809_v63 = vmul.f32 %v2537_v61, %v2537_v61 }
 0x197   : > { %v769_v56 = vpop.f32.mrf.mxu1 }
 0x198   : > { %v2531_v57 = vadd.f32 %v1920_v48, %v769_v56  ;;  %824 = vadd.xlane.f32.xlu0 %v802_v55 }
 0x19a   : > { %v803_v58 = vmul.f32 %v2531_v57, %v2531_v57 }
 0x19b   : > { %v790_v59 = vpop.f32.mrf.mxu3 }
 0x19c   : > { %v2535_v60 = vadd.f32 %v1920_v48, %v790_v59  ;;  %826 = vadd.xlane.f32.xlu1 %v803_v58 }
 0x19e   : > { %v810_v62 = vmul.f32 %v2535_v60, %v2535_v60 }
 0x1a0   : > { %840 = vadd.xlane.f32.xlu2 %v810_v62 }
 0x1a3   : > { %v793_v0 = vpop.f32.mrf.mxu3 }
 0x1a4   : > { %v2543_v1 = vadd.f32 %v1920_v48, %v793_v0  ;;  %838 = vadd.xlane.f32.xlu1 %v809_v63 }
 0x1a6   : > { %v811_v2 = vmul.f32 %v2543_v1, %v2543_v1 }
 0x1a8   : > { %842 = vadd.xlane.f32.xlu0 %v811_v2 }
 0x1d7   : > { %v813_v3 = vpop.xlane.xlu0 %812 }
 0x1d8   : > { %1953 = vrsqrt.f32 %v813_v3  ;;  %vm850_vm1 = vweird.f32 %v813_v3 }
 0x1de   : > { %v1954_v4 = vpop.eup %1953 }
 0x1df   : > { %v845_v5 = vmul.f32 %v1954_v4, %v813_v3  ;;  %v815_v6 = vpop.xlane.xlu0 %814  ;;  %vm851_vm0 = vweird.f32 %v1954_v4 }
 0x1e0   : > { %1955 = vrsqrt.f32 %v815_v6  ;;  %vm852_vm3 = vmor %vm850_vm1, %vm851_vm0  ;;  %vm860_vm4 = vweird.f32 %v815_v6 }
 0x1e1   : > { %v846_v7 = vmul.f32 %v1954_v4, %v845_v5 }
 0x1e3   : > { %v847_v8 = vmul.f32 0.5, %v846_v7  ;;  %v829_v9 = vpop.xlane.xlu2 %828 }
 0x1e4   : > { %1957 = vrsqrt.f32 %v829_v9  ;;  %vm930_vm7 = vweird.f32 %v829_v9 }
 0x1e5   : > { %v848_v11 = vsub.f32 1.5, %v847_v8 }
 0x1e6   : > { %v1956_v10 = vpop.eup %1955 }
 0x1e7   : > { %v855_v12 = vmul.f32 %v1956_v10, %v815_v6  ;;  %v817_v13 = vpop.xlane.xlu1 %816  ;;  %v849_v16 = vmul.f32 %v1954_v4, %v848_v11  ;;  %vm861_vm2 = vweird.f32 %v1956_v10 }
 0x1e8   : > { %1959 = vrsqrt.f32 %v817_v13  ;;  %vm862_vm5 = vmor %vm860_vm4, %vm861_vm2  ;;  %vm870_vm13 = vweird.f32 %v817_v13 }
 0x1e9   : > { %v856_v14 = vmul.f32 %v1956_v10, %v855_v12  ;;  %v853_v24 = vsel %vm852_vm3, %v1954_v4, %v849_v16 }
 0x1ea   : > { %v1958_v15 = vpop.eup %1957  ;;  %v1004_v36 = vmul.f32 %v853_v24, %v2483_v19 }
 0x1eb   : > { %v857_v17 = vmul.f32 0.5, %v856_v14  ;;  %v925_v48 = vmul.f32 %v1958_v15, %v829_v9  ;;  %v831_v18 = vpop.xlane.xlu0 %830  ;;  %vm931_vm6 = vweird.f32 %v1958_v15 }
 0x1ec   : > { %1961 = vrsqrt.f32 %v831_v18  ;;  %vm932_vm9 = vmor %vm930_vm7, %vm931_vm6  ;;  %vm940_vm11 = vweird.f32 %v831_v18 }
 0x1ed   : > { %v858_v20 = vsub.f32 1.5, %v857_v17  ;;  %v926_v21 = vmul.f32 %v1958_v15, %v925_v48 }
 0x1ee   : > { %v1960_v23 = vpop.eup %1959 }
 0x1ef   : > { %v859_v26 = vmul.f32 %v1956_v10, %v858_v20  ;;  %v927_v27 = vmul.f32 0.5, %v926_v21  ;;  %v865_v29 = vmul.f32 %v1960_v23, %v817_v13  ;;  %v819_v30 = vpop.xlane.xlu1 %818  ;;  %vm871_vm10 = vweird.f32 %v1960_v23 }
 0x1f0   : > { %1963 = vrsqrt.f32 %v819_v30  ;;  %vm872_vm15 = vmor %vm870_vm13, %vm871_vm10  ;;  %vm880_vm0 = vweird.f32 %v819_v30 }
 0x1f1   : > { %v863_v32 = vsel %vm862_vm5, %v1956_v10, %v859_v26  ;;  %v866_v33 = vmul.f32 %v1960_v23, %v865_v29  ;;  %v928_v40 = vsub.f32 1.5, %v927_v27 }
 0x1f2   : > { %v1962_v35 = vpop.eup %1961  ;;  %v1005_v38 = vmul.f32 %v863_v32, %v2487_v22 }
 0x1f3   : > { %v867_v41 = vmul.f32 0.5, %v866_v33  ;;  %v935_v42 = vmul.f32 %v1962_v35, %v831_v18  ;;  %v929_v50 = vmul.f32 %v1958_v15, %v928_v40  ;;  %vm941_vm8 = vweird.f32 %v1962_v35 }
 0x1f4   : > { %v1735_v44 = vpack.c.bf16 %v1005_v38, %v1004_v36  ;;  %vm942_vm12 = vmor %vm940_vm11, %vm941_vm8 }
 0x1f5   : > { %v936_v45 = vmul.f32 %v1962_v35, %v935_v42  ;;  %v868_v51 = vsub.f32 1.5, %v867_v41  ;;  %v933_v22 = vsel %vm932_vm9, %v1958_v15, %v929_v50 }
 0x1f6   : > { %v1964_v46 = vpop.eup %1963  ;;  %1736 = vst [vmem:[#allocation2 + $0x30] sm:$0xff] %v1735_v44   ;;  %v1012_v3 = vmul.f32 %v933_v22, %v2491_v25 }
 0x1f7   : > { %v937_v53 = vmul.f32 0.5, %v936_v45  ;;  %v875_v54 = vmul.f32 %v1964_v46, %v819_v30  ;;  %v2549_v55 = vpop.xlane.xlu2 %820  ;;  %v833_v56 = vpop.xlane.xlu1 %832  ;;  %v869_v59 = vmul.f32 %v1960_v23, %v868_v51  ;;  %vm881_vm14 = vweird.f32 %v1964_v46 }
 0x1f8   : > { %1965 = vrsqrt.f32 %v833_v56  ;;  %vm882_vm1 = vmor %vm880_vm0, %vm881_vm14  ;;  %vm950_vm3 = vweird.f32 %v833_v56  ;;  %vm890_vm9 = vweird.f32 %v2549_v55 }
 0x1f9   : > { %v938_v58 = vsub.f32 1.5, %v937_v53  ;;  %v876_v19 = vmul.f32 %v1964_v46, %v875_v54  ;;  %1967 = vrsqrt.f32 %v2549_v55  ;;  %v873_v6 = vsel %vm872_vm15, %v1960_v23, %v869_v59 }
 0x1fa   : > { %v1006_v13 = vmul.f32 %v873_v6, %v2495_v28 }
 0x1fb   : > { %v939_v62 = vmul.f32 %v1962_v35, %v938_v58  ;;  %v877_v63 = vmul.f32 0.5, %v876_v19  ;;  %v2227_v58 = vmov 0.0  }
 0x1fc   : > { %1052 = vst [vmem:[%s2406_s24] sm:$0xff] %v2227_v58 }
 0x1fd   : > { %v943_v0 = vsel %vm942_vm12, %v1962_v35, %v939_v62  ;;  %v878_v2 = vsub.f32 1.5, %v877_v63  ;;  %1053 = vst [vmem:[%s2408_s27] sm:$0xff] %v2227_v58 }
 0x1fe   : > { %v1013_v4 = vmul.f32 %v943_v0, %v2499_v31  ;;  %v1966_v5 = vpop.eup %1965 }
 0x1ff   : > { %v879_v7 = vmul.f32 %v1964_v46, %v878_v2  ;;  %v835_v8 = vpop.xlane.xlu2 %834  ;;  %v2554_v9 = vpop.eup %1967  ;;  %v945_v11 = vmul.f32 %v1966_v5, %v833_v56  ;;  %vm951_vm2 = vweird.f32 %v1966_v5 }
 0x200   : > { %v1755_v10 = vpack.c.bf16 %v1013_v4, %v1012_v3  ;;  %1969 = vrsqrt.f32 %v835_v8  ;;  %v885_v31 = vmul.f32 %v2554_v9, %v2549_v55  ;;  %vm952_vm5 = vmor %vm950_vm3, %vm951_vm2  ;;  %vm960_vm6 = vweird.f32 %v835_v8 }
 0x201   : > { %v883_v12 = vsel %vm882_vm1, %v1964_v46, %v879_v7  ;;  %v946_v14 = vmul.f32 %v1966_v5, %v945_v11  ;;  %vm891_vm8 = vweird.f32 %v2554_v9 }
 0x202   : > { %1775 = vst [vmem:[#allocation2 + $0x8] sm:$0xff] %v1755_v10   ;;  %v1007_v25 = vmul.f32 %v883_v12, %v2503_v34  ;;  %v886_v18 = vmul.f32 %v2554_v9, %v885_v31  ;;  %vm892_vm11 = vmor %vm890_vm9, %vm891_vm8 }
 0x203   : > { %v2560_v15 = vpop.xlane.xlu0 %836  ;;  %v947_v17 = vmul.f32 0.5, %v946_v14 }
 0x204   : > { %v1740_v16 = vpack.c.bf16 %v1007_v25, %v1006_v13  ;;  %v887_v34 = vmul.f32 0.5, %v886_v18 }
 0x205   : > { %v948_v20 = vsub.f32 1.5, %v947_v17 }
 0x206   : > { %v1970_v48 = vpop.eup %1969  ;;  %1772 = vst [vmem:[#allocation2] sm:$0xff] %v1740_v16   ;;  %v888_v33 = vsub.f32 1.5, %v887_v34 }
 0x207   : > { %v955_v21 = vmul.f32 %v1970_v48, %v835_v8  ;;  %v823_v23 = vpop.xlane.xlu2 %822  ;;  %v949_v24 = vmul.f32 %v1966_v5, %v948_v20  ;;  %vm961_vm4 = vweird.f32 %v1970_v48 }
 0x208   : > { %1971 = vrsqrt.f32 %v823_v23  ;;  %vm962_vm7 = vmor %vm960_vm6, %vm961_vm4  ;;  %v889_v51 = vmul.f32 %v2554_v9, %v888_v33  ;;  %vm900_vm12 = vweird.f32 %v823_v23 }
 0x209   : > { %v956_v28 = vmul.f32 %v1970_v48, %v955_v21  ;;  %1973 = vrsqrt.f32 %v2560_v15  ;;  %v953_v35 = vsel %vm952_vm5, %v1966_v5, %v949_v24  ;;  %vm970_vm5 = vweird.f32 %v2560_v15 }
 0x20a   : > { %v1014_v45 = vmul.f32 %v953_v35, %v2507_v37  ;;  %v893_v62 = vsel %vm892_vm11, %v2554_v9, %v889_v51 }
 0x20b   : > { %v957_v26 = vmul.f32 0.5, %v956_v28  ;;  %v2564_v27 = vpop.xlane.xlu0 %824  ;;  %v1008_v7 = vmul.f32 %v893_v62, %v2509_v39 }
 0x20c   : > { %1975 = vrsqrt.f32 %v2564_v27  ;;  %vm910_vm15 = vweird.f32 %v2564_v27 }
 0x20d   : > { %v958_v29 = vsub.f32 1.5, %v957_v26 }
 0x20e   : > { %v1972_v30 = vpop.eup %1971 }
 0x20f   : > { %v2567_v32 = vpop.eup %1973  ;;  %v959_v36 = vmul.f32 %v1970_v48, %v958_v29  ;;  %v895_v38 = vmul.f32 %v1972_v30, %v823_v23  ;;  %v827_v40 = vpop.xlane.xlu1 %826  ;;  %vm901_vm10 = vweird.f32 %v1972_v30 }
 0x210   : > { %1977 = vrsqrt.f32 %v827_v40  ;;  %v965_v50 = vmul.f32 %v2567_v32, %v2560_v15  ;;  %vm902_vm13 = vmor %vm900_vm12, %vm901_vm10  ;;  %vm920_vm2 = vweird.f32 %v827_v40  ;;  %vm971_vm4 = vweird.f32 %v2567_v32 }
 0x211   : > { %v963_v41 = vsel %vm962_vm7, %v1970_v48, %v959_v36  ;;  %v896_v42 = vmul.f32 %v1972_v30, %v895_v38  ;;  %vm2604_vm6 = vmor %vm970_vm5, %vm971_vm4 }
 0x212   : > { %v2569_v44 = vpop.eup %1975  ;;  %v1015_v46 = vmul.f32 %v963_v41, %v2515_v43  ;;  %v966_v59 = vmul.f32 %v2567_v32, %v965_v50 }
 0x213   : > { %v897_v53 = vmul.f32 0.5, %v896_v42  ;;  %v905_v54 = vmul.f32 %v2569_v44, %v2564_v27  ;;  %v2579_v56 = vpop.xlane.xlu2 %840  ;;  %vm911_vm14 = vweird.f32 %v2569_v44 }
 0x214   : > { %v1760_v19 = vpack.c.bf16 %v1015_v46, %v1014_v45  ;;  %1979 = vrsqrt.f32 %v2579_v56  ;;  %v967_v8 = vmul.f32 0.5, %v966_v59  ;;  %vm912_vm1 = vmor %vm910_vm15, %vm911_vm14  ;;  %vm990_vm11 = vweird.f32 %v2579_v56 }
 0x215   : > { %v898_v37 = vsub.f32 1.5, %v897_v53  ;;  %v906_v43 = vmul.f32 %v2569_v44, %v905_v54 }
 0x216   : > { %v1978_v22 = vpop.eup %1977  ;;  %1776 = vst [vmem:[#allocation2 + $0x20] sm:$0xff] %v1760_v19   ;;  %v968_v16 = vsub.f32 1.5, %v967_v8 }
 0x217   : > { %v899_v63 = vmul.f32 %v1972_v30, %v898_v37  ;;  %v907_v0 = vmul.f32 0.5, %v906_v43  ;;  %v915_v2 = vmul.f32 %v1978_v22, %v827_v40  ;;  %v839_v3 = vpop.xlane.xlu1 %838  ;;  %vm921_vm0 = vweird.f32 %v1978_v22 }
 0x218   : > { %1981 = vrsqrt.f32 %v839_v3  ;;  %vm922_vm3 = vmor %vm920_vm2, %vm921_vm0  ;;  %v969_v28 = vmul.f32 %v2567_v32, %v968_v16  ;;  %vm980_vm8 = vweird.f32 %v839_v3 }
 0x219   : > { %v903_v4 = vsel %vm902_vm13, %v1972_v30, %v899_v63  ;;  %v908_v55 = vsub.f32 1.5, %v907_v0  ;;  %v916_v5 = vmul.f32 %v1978_v22, %v915_v2 }
 0x21a   : > { %v2588_v6 = vpop.eup %1979  ;;  %v1009_v10 = vmul.f32 %v903_v4, %v2521_v49  ;;  %v973_v38 = vsel %vm2604_vm6, %v2567_v32, %v969_v28 }
 0x21b   : > { %v909_v11 = vmul.f32 %v2569_v44, %v908_v55  ;;  %v917_v9 = vmul.f32 0.5, %v916_v5  ;;  %v985_v12 = vmul.f32 %v2588_v6, %v2579_v56  ;;  %v843_v13 = vpop.xlane.xlu0 %842  ;;  %vm991_vm9 = vweird.f32 %v2588_v6 }
 0x21c   : > { %v1745_v25 = vpack.c.bf16 %v1009_v10, %v1008_v7  ;;  %1983 = vrsqrt.f32 %v843_v13  ;;  %v1016_v42 = vmul.f32 %v973_v38, %v2519_v47  ;;  %vm992_vm13 = vmor %vm990_vm11, %vm991_vm9  ;;  %vm1000_vm14 = vweird.f32 %v843_v13 }
 0x21d   : > { %v918_v14 = vsub.f32 1.5, %v917_v9  ;;  %v986_v39 = vmul.f32 %v2588_v6, %v985_v12  ;;  %v913_v49 = vsel %vm912_vm1, %v2569_v44, %v909_v11 }
 0x21e   : > { %v1982_v31 = vpop.eup %1981  ;;  %1773 = vst [vmem:[#allocation2 + $0x18] sm:$0xff] %v1745_v25   ;;  %v1010_v34 = vmul.f32 %v913_v49, %v2525_v52 }
 0x21f   : > { %v919_v17 = vmul.f32 %v1978_v22, %v918_v14  ;;  %v987_v48 = vmul.f32 0.5, %v986_v39  ;;  %v975_v18 = vmul.f32 %v1982_v31, %v839_v3  ;;  %vm981_vm7 = vweird.f32 %v1982_v31 }
 0x220   : > { %vm982_vm10 = vmor %vm980_vm8, %vm981_vm7 }
 0x221   : > { %v923_v20 = vsel %vm922_vm3, %v1978_v22, %v919_v17  ;;  %v976_v21 = vmul.f32 %v1982_v31, %v975_v18  ;;  %v988_v26 = vsub.f32 1.5, %v987_v48 }
 0x222   : > { %v1984_v23 = vpop.eup %1983  ;;  %v1011_v24 = vmul.f32 %v923_v20, %v2531_v57 }
 0x223   : > { %v977_v27 = vmul.f32 0.5, %v976_v21  ;;  %v995_v29 = vmul.f32 %v1984_v23, %v843_v13  ;;  %v989_v52 = vmul.f32 %v2588_v6, %v988_v26  ;;  %vm1001_vm12 = vweird.f32 %v1984_v23 }
 0x224   : > { %v1750_v30 = vpack.c.bf16 %v1011_v24, %v1010_v34  ;;  %vm1002_vm15 = vmor %vm1000_vm14, %vm1001_vm12 }
 0x225   : > { %v978_v35 = vsub.f32 1.5, %v977_v27  ;;  %v996_v36 = vmul.f32 %v1984_v23, %v995_v29  ;;  %v993_v32 = vsel %vm992_vm13, %v2588_v6, %v989_v52 }
 0x226   : > { %1774 = vst [vmem:[#allocation2 + $0x10] sm:$0xff] %v1750_v30   ;;  %v1018_v51 = vmul.f32 %v993_v32, %v2535_v60 }
 0x227   : > { %v979_v57 = vmul.f32 %v1982_v31, %v978_v35  ;;  %v997_v15 = vmul.f32 0.5, %v996_v36 }
 0x229   : > { %v983_v40 = vsel %vm982_vm10, %v1982_v31, %v979_v57  ;;  %v998_v41 = vsub.f32 1.5, %v997_v15 }
 0x22a   : > { %v1017_v44 = vmul.f32 %v983_v40, %v2537_v61 }
 0x22b   : > { %v999_v45 = vmul.f32 %v1984_v23, %v998_v41 }
 0x22c   : > { %v1765_v46 = vpack.c.bf16 %v1017_v44, %v1016_v42 }
 0x22d   : > { %v1003_v50 = vsel %vm1002_vm15, %v1984_v23, %v999_v45 }
 0x22e   : > { %1777 = vst [vmem:[#allocation2 + $0x28] sm:$0xff] %v1765_v46   ;;  %v1019_v53 = vmul.f32 %v1003_v50, %v2543_v1 }
 0x230   : > { %v1770_v54 = vpack.c.bf16 %v1019_v53, %v1018_v51 }
 0x232   : > { %1778 = vst [vmem:[#allocation2 + $0x38] sm:$0xff] %v1770_v54  }
 0x233 PF: > { %v1073_v56 = vld [vmem:[#allocation3 + $0x78] sm:$0xff]  ;;  %v1072_v47 = vld [vmem:[#allocation3 + $0x70] sm:$0xff]  ;;  %v1071_v58 = vld [vmem:[#allocation3 + $0x68] sm:$0xff]  ;;  %s1441_s22 = sshll.u32 %s2406_s24, 4  ;;  %s2107_s20 = scalar_lea.hbm %s2737_s9, 16  ;;  %s1442_s22 = int_to_ptr.vmem [resolvable:$true] %s1441_s22 }
 0x234   : > { %1078 = vmatpush.msra.mxu0 %v1073_v56  ;;  %v1070_v61 = vld [vmem:[#allocation3 + $0x60] sm:$0xff]  ;;  %v1069_v19 = vld [vmem:[#allocation3 + $0x58] sm:$0xff]  ;;  %v1068_v37 = vld [vmem:[#allocation3 + $0x50] sm:$0xff] }
 0x235   : > { %v1067_v43 = vld [vmem:[#allocation3 + $0x48] sm:$0xff]  ;;  %v1066_v60 = vld [vmem:[#allocation3 + $0x40] sm:$0xff]  ;;  %v1065_v22 = vld [vmem:[#allocation3 + $0x38] sm:$0xff] }
 0x236   : > { %1079 = vmatpush.msra.mxu0 %v1072_v47  ;;  %v1064_v1 = vld [vmem:[#allocation3 + $0x30] sm:$0xff]  ;;  %v1063_v59 = vld [vmem:[#allocation3 + $0x28] sm:$0xff]  ;;  %v1062_v62 = vld [vmem:[#allocation3 + $0x20] sm:$0xff] }
 0x237   : > { %v1061_v63 = vld [vmem:[#allocation3 + $0x18] sm:$0xff]  ;;  %v1060_v0 = vld [vmem:[#allocation3 + $0x10] sm:$0xff]  ;;  %v1059_v4 = vld [vmem:[#allocation3 + $0x8] sm:$0xff] }
 0x238   : > { %1080 = vmatpush.msra.mxu0 %v1071_v58  ;;  %v1142_v2 = vld [vmem:[#allocation6 + $0x78] sm:$0xff]  ;;  %v1141_v3 = vld [vmem:[#allocation6 + $0x70] sm:$0xff]  ;;  %v1140_v55 = vld [vmem:[#allocation6 + $0x68] sm:$0xff] }
 0x239   : > { %1147 = vmatpush.msra.mxu1 %v1142_v2  ;;  %v1058_v5 = vld [vmem:[#allocation3] sm:$0xff]  ;;  %v1138_v8 = vld [vmem:[#allocation6 + $0x58] sm:$0xff]  ;;  %v1137_v10 = vld [vmem:[#allocation6 + $0x50] sm:$0xff] }
 0x23a   : > { %1081 = vmatpush.msra.mxu0 %v1070_v61  ;;  %v1139_v6 = vld [vmem:[#allocation6 + $0x60] sm:$0xff]  ;;  %v1136_v11 = vld [vmem:[#allocation6 + $0x48] sm:$0xff]  ;;  %v1056_v13 = vld [vmem:[%s2389_s12 + $0x10] sm:$0xff] }
 0x23b   : > { %1148 = vmatpush.msra.mxu1 %v1141_v3  ;;  %v1054_v7 = vld [vmem:[%s2389_s12] sm:$0xff]  ;;  %v1055_v12 = vld [vmem:[%s2389_s12 + $0x8] sm:$0xff]  ;;  %v1057_v25 = vld [vmem:[%s2389_s12 + $0x18] sm:$0xff] }
 0x23c   : > { %1082 = vmatpush.msra.mxu0 %v1069_v19  ;;  %v1135_v9 = vld [vmem:[#allocation6 + $0x40] sm:$0xff]  ;;  %v1134_v14 = vld [vmem:[#allocation6 + $0x38] sm:$0xff]  ;;  %v1133_v39 = vld [vmem:[#allocation6 + $0x30] sm:$0xff] }
 0x23d   : > { %1149 = vmatpush.msra.mxu1 %v1140_v55  ;;  %v1132_v31 = vld [vmem:[#allocation6 + $0x28] sm:$0xff]  ;;  %v1131_v16 = vld [vmem:[#allocation6 + $0x20] sm:$0xff]  ;;  %v1130_v49 = vld [vmem:[#allocation6 + $0x18] sm:$0xff] }
 0x23e   : > { %1083 = vmatpush.msra.mxu0 %v1068_v37  ;;  %v1129_v17 = vld [vmem:[#allocation6 + $0x10] sm:$0xff]  ;;  %v1128_v48 = vld [vmem:[#allocation6 + $0x8] sm:$0xff]  ;;  %v1127_v18 = vld [vmem:[#allocation6] sm:$0xff] }
 0x23f   : > { %1150 = vmatpush.msra.mxu1 %v1139_v6  ;;  %v1985_v20 = vld [vmem:[%s2731_s3] ss:$0 sm:$0xff]  ;;  %v1731_v53 = vld [vmem:[#allocation2 + $0x38] sm:$0xff]  ;;  %v1730_v58 = vld [vmem:[#allocation2 + $0x28] sm:$0xff] }
 0x240   : > { %1084 = vmatpush.msra.mxu0 %v1067_v43  ;;  %v1986_v51 = vld [vmem:[%s2733_s5] ss:$0 sm:$0xff]  ;;  %1302 = vmatpush.bf16.xpose.msra.mxu2 %v1731_v53  ;;  %v1727_v2 = vld [vmem:[#allocation2 + $0x10] sm:$0xff]  ;;  %v1726_v3 = vld [vmem:[#allocation2 + $0x18] sm:$0xff] }
 0x241   : > { %1151 = vmatpush.msra.mxu1 %v1138_v8  ;;  %1811 = vmatpush.bf16.xpose.msra.mxu3 %v1731_v53  ;;  %v1729_v43 = vld [vmem:[#allocation2 + $0x20] sm:$0xff]  ;;  %v1724_v55 = vld [vmem:[#allocation2 + $0x30] sm:$0xff] }
 0x242   : > { %1085 = vmatpush.msra.mxu0 %v1066_v60 }
 0x243   : > { %1152 = vmatpush.msra.mxu1 %v1137_v10 }
 0x244   : > { %1086 = vmatpush.msra.mxu0 %v1065_v22 }
 0x245   : > { %1153 = vmatpush.msra.mxu1 %v1136_v11 }
 0x246   : > { %1087 = vmatpush.msra.mxu0 %v1064_v1 }
 0x247   : > { %1154 = vmatpush.msra.mxu1 %v1135_v9 }
 0x248   : > { %1088 = vmatpush.msra.mxu0 %v1063_v59  ;;  %1303 = vmatpush.bf16.xpose.msra.mxu2 %v1730_v58  ;;  %v1728_v59 = vld [vmem:[#allocation2 + $0x8] sm:$0xff] }
 0x249   : > { %1155 = vmatpush.msra.mxu1 %v1134_v14  ;;  %1812 = vmatpush.bf16.xpose.msra.mxu3 %v1730_v58 }
 0x24a   : > { %1089 = vmatpush.msra.mxu0 %v1062_v62 }
 0x24b   : > { %1156 = vmatpush.msra.mxu1 %v1133_v39 }
 0x24c   : > { %1090 = vmatpush.msra.mxu0 %v1061_v63 }
 0x24d   : > { %1157 = vmatpush.msra.mxu1 %v1132_v31 }
 0x24e   : > { %1091 = vmatpush.msra.mxu0 %v1060_v0 }
 0x24f   : > { %1158 = vmatpush.msra.mxu1 %v1131_v16 }
 0x250   : > { %1092 = vmatpush.msra.mxu0 %v1059_v4  ;;  %1304 = vmatpush.bf16.xpose.msra.mxu2 %v1729_v43  ;;  %v1725_v4 = vld [vmem:[#allocation2] sm:$0xff] }
 0x251   : > { %1159 = vmatpush.msra.mxu1 %v1130_v49  ;;  %1813 = vmatpush.bf16.xpose.msra.mxu3 %v1729_v43 }
 0x252   : > { %1093 = vmatpush.msra.mxu0 %v1058_v5 }
 0x253   : > { %1094 = vmatmul.f32.vlgmr.msra.gmra.mxu0 %v1054_v7  ;;  %1160 = vmatpush.msra.mxu1 %v1129_v17 }
 0x255   : > { %1161 = vmatpush.msra.mxu1 %v1128_v48 }
 0x257   : > { %1162 = vmatpush.msra.mxu1 %v1127_v18 }
 0x258   : > { %1305 = vmatpush.bf16.xpose.msra.mxu2 %v1728_v59 }
 0x259   : > { %1814 = vmatpush.bf16.xpose.msra.mxu3 %v1728_v59 }
 0x25b   : > { %1097 = vmatmul.f32.gmra.mxu0 %v1055_v12 }
 0x260   : > { %1306 = vmatpush.bf16.xpose.msra.mxu2 %v1727_v2 }
 0x261   : > { %1815 = vmatpush.bf16.xpose.msra.mxu3 %v1727_v2  ;;  %v1344_v2 = vld [vmem:[%s2399_s2 + $0x18] sm:$0xff] }
 0x263   : > { %1100 = vmatmul.f32.gmra.mxu0 %v1056_v13 }
 0x268   : > { %1307 = vmatpush.bf16.xpose.msra.mxu2 %v1726_v3 }
 0x269   : > { %1816 = vmatpush.bf16.xpose.msra.mxu3 %v1726_v3 }
 0x26b   : > { %1103 = vmatmul.f32.gmra.mxu0 %v1057_v25 }
 0x270   : > { %1308 = vmatpush.bf16.xpose.msra.mxu2 %v1725_v4 }
 0x271   : > { %1817 = vmatpush.bf16.xpose.msra.mxu3 %v1725_v4 }
 0x278   : > { %1309 = vmatpush.bf16.xpose.msra.mxu2 %v1724_v55 }
 0x279   : > { %1818 = vmatpush.bf16.xpose.msra.mxu3 %v1724_v55 }
 0x2d0   : > { %v1095_v21 = vpop.f32.mrf.mxu0 }
 0x2d1   : > { %v1096_v23 = vadd.f32 %v1985_v20, %v1095_v21 }
 0x2d3   : > { %v1111_v28 = vmul.f32 1.442695, %v1096_v23  ;;  %vm1107_vm0 = vcmp.gt.f32.partialorder %v1096_v23, 0.0 }
 0x2d5   : > { %1987 = vpow2.f32 %v1111_v28 }
 0x2d8   : > { %v1098_v34 = vpop.f32.mrf.mxu0 }
 0x2d9   : > { %v1099_v24 = vadd.f32 %v1985_v20, %v1098_v34 }
 0x2db   : > { %v1988_v26 = vpop.eup %1987  ;;  %v1113_v27 = vmul.f32 1.442695, %v1099_v24  ;;  %vm1108_vm1 = vcmp.gt.f32.partialorder %v1099_v24, 0.0 }
 0x2dc   : > { %v1682_v29 = vadd.f32 -1.0, %v1988_v26 }
 0x2dd   : > { %1989 = vpow2.f32 %v1113_v27 }
 0x2de   : > { %v1123_v30 = vsel %vm1107_vm0, %v1096_v23, %v1682_v29 }
 0x2df   : > { %1163 = vmatmul.f32.vlgmr.msra.gmra.mxu1 %v1123_v30 }
 0x2e0   : > { %v1101_v33 = vpop.f32.mrf.mxu0 }
 0x2e1   : > { %v1102_v35 = vadd.f32 %v1985_v20, %v1101_v33 }
 0x2e3   : > { %v1990_v36 = vpop.eup %1989  ;;  %v1115_v38 = vmul.f32 1.442695, %v1102_v35  ;;  %vm1109_vm2 = vcmp.gt.f32.partialorder %v1102_v35, 0.0 }
 0x2e4   : > { %v1683_v52 = vadd.f32 -1.0, %v1990_v36 }
 0x2e5   : > { %1991 = vpow2.f32 %v1115_v38 }
 0x2e6   : > { %v1124_v57 = vsel %vm1108_vm1, %v1099_v24, %v1683_v52 }
 0x2e7   : > { %1166 = vmatmul.f32.gmra.mxu1 %v1124_v57 }
 0x2e8   : > { %v1104_v15 = vpop.f32.mrf.mxu0 }
 0x2e9   : > { %v1105_v40 = vadd.f32 %v1985_v20, %v1104_v15 }
 0x2eb   : > { %v1992_v41 = vpop.eup %1991  ;;  %v1117_v42 = vmul.f32 1.442695, %v1105_v40  ;;  %vm1110_vm3 = vcmp.gt.f32.partialorder %v1105_v40, 0.0 }
 0x2ec   : > { %v1684_v44 = vadd.f32 -1.0, %v1992_v41 }
 0x2ed   : > { %1993 = vpow2.f32 %v1117_v42 }
 0x2ee   : > { %v1125_v32 = vsel %vm1109_vm2, %v1102_v35, %v1684_v44 }
 0x2ef   : > { %1169 = vmatmul.f32.gmra.mxu1 %v1125_v32 }
 0x2f3   : > { %v1994_v45 = vpop.eup %1993 }
 0x2f4   : > { %v1685_v46 = vadd.f32 -1.0, %v1994_v45 }
 0x2f6   : > { %v1126_v50 = vsel %vm1110_vm3, %v1105_v40, %v1685_v46 }
 0x2f7   : > { %1172 = vmatmul.f32.gmra.mxu1 %v1126_v50 }
 0x35c   : > { %v1164_v54 = vpop.f32.mrf.mxu1 }
 0x35d   : > { %v2629_v56 = vadd.f32 %v1986_v51, %v1164_v54 }
 0x35f   : > { %v1176_v47 = vmul.f32 %v2629_v56, %v2629_v56 }
 0x361   : > { %1180 = vadd.xlane.f32.xlu0 %v1176_v47 }
 0x364   : > { %v1167_v61 = vpop.f32.mrf.mxu1 }
 0x365   : > { %v2633_v19 = vadd.f32 %v1986_v51, %v1167_v61 }
 0x367   : > { %v1177_v37 = vmul.f32 %v2633_v19, %v2633_v19 }
 0x369   : > { %1182 = vadd.xlane.f32.xlu0 %v1177_v37  ;;  %v1342_v37 = vld [vmem:[%s2399_s2 + $0x8] sm:$0xff] }
 0x36a   : > { %vm1346_vm1 = vcmp.ne.s32.totalorder %v1342_v37, 0 }
 0x36c   : > { %v1170_v60 = vpop.f32.mrf.mxu1 }
 0x36d   : > { %v2637_v22 = vadd.f32 %v1986_v51, %v1170_v60 }
 0x36f   : > { %v1178_v1 = vmul.f32 %v2637_v22, %v2637_v22 }
 0x371   : > { %1184 = vadd.xlane.f32.xlu1 %v1178_v1  ;;  %v1343_v1 = vld [vmem:[%s2399_s2 + $0x10] sm:$0xff] }
 0x372   : > { %vm1347_vm3 = vcmp.ne.s32.totalorder %v1343_v1, 0 }
 0x374   : > { %v1173_v62 = vpop.f32.mrf.mxu1 }
 0x375   : > { %v2641_v63 = vadd.f32 %v1986_v51, %v1173_v62 }
 0x377   : > { %v1179_v0 = vmul.f32 %v2641_v63, %v2641_v63 }
 0x379   : > { %1186 = vadd.xlane.f32.xlu1 %v1179_v0  ;;  %v1332_v0 = vld [vmem:[%s2394_s29 + $0x18] sm:$0xff] }
 0x3d4   : > { %v1181_v5 = vpop.xlane.xlu0 %1180 }
 0x3d5   : > { %1995 = vrsqrt.f32 %v1181_v5  ;;  %vm1194_vm5 = vweird.f32 %v1181_v5 }
 0x3db   : > { %v1996_v6 = vpop.eup %1995 }
 0x3dc   : > { %v1189_v7 = vmul.f32 %v1996_v6, %v1181_v5  ;;  %v1183_v8 = vpop.xlane.xlu0 %1182  ;;  %vm1195_vm4 = vweird.f32 %v1996_v6 }
 0x3dd   : > { %1997 = vrsqrt.f32 %v1183_v8  ;;  %vm1196_vm6 = vmor %vm1194_vm5, %vm1195_vm4  ;;  %vm1204_vm8 = vweird.f32 %v1183_v8  ;;  %vm1336_vm5 = vcmp.ne.s32.totalorder %v1332_v0, 0 }
 0x3de   : > { %v1190_v10 = vmul.f32 %v1996_v6, %v1189_v7 }
 0x3e0   : > { %v1191_v11 = vmul.f32 0.5, %v1190_v10 }
 0x3e2   : > { %v1192_v9 = vsub.f32 1.5, %v1191_v11  ;;  %v1398_v11 = vld [vmem:[%s2406_s24] sm:$0xff] }
 0x3e3   : > { %v1998_v12 = vpop.eup %1997 }
 0x3e4   : > { %v1199_v13 = vmul.f32 %v1998_v12, %v1183_v8  ;;  %v1185_v25 = vpop.xlane.xlu1 %1184  ;;  %v1193_v14 = vmul.f32 %v1996_v6, %v1192_v9  ;;  %vm1205_vm7 = vweird.f32 %v1998_v12 }
 0x3e5   : > { %1999 = vrsqrt.f32 %v1185_v25  ;;  %vm1206_vm9 = vmor %vm1204_vm8, %vm1205_vm7  ;;  %vm1214_vm11 = vweird.f32 %v1185_v25 }
 0x3e6   : > { %v1200_v39 = vmul.f32 %v1998_v12, %v1199_v13  ;;  %v1197_v49 = vsel %vm1196_vm6, %v1996_v6, %v1193_v14  ;;  %vm1348_vm6 = vcmp.ne.s32.totalorder %v1344_v2, 0  ;;  %v1404_v14 = vld [vmem:[%s2408_s27] sm:$0xff] }
 0x3e7   : > { %v1228_v21 = vmul.f32 1.25, %v1197_v49 }
 0x3e8   : > { %v1201_v31 = vmul.f32 0.5, %v1200_v39  ;;  %v1331_v39 = vld [vmem:[%s2394_s29 + $0x10] sm:$0xff] }
 0x3e9   : > { %v1232_v26 = vmul.f32 %v1228_v21, %v2629_v56  ;;  %v1329_v56 = vld [vmem:[%s2394_s29] sm:$0xff]  ;;  %vm1335_vm7 = vcmp.ne.s32.totalorder %v1331_v39, 0 }
 0x3ea   : > { %v1202_v16 = vsub.f32 1.5, %v1201_v31  ;;  %vm1333_vm0 = vcmp.ne.s32.totalorder %v1329_v56, 0 }
 0x3eb   : > { %v2000_v17 = vpop.eup %1999 }
 0x3ec   : > { %v1203_v48 = vmul.f32 %v1998_v12, %v1202_v16  ;;  %v1209_v18 = vmul.f32 %v2000_v17, %v1185_v25  ;;  %v1187_v20 = vpop.xlane.xlu1 %1186  ;;  %vm1215_vm10 = vweird.f32 %v2000_v17 }
 0x3ed   : > { %2001 = vrsqrt.f32 %v1187_v20  ;;  %vm1216_vm12 = vmor %vm1214_vm11, %vm1215_vm10  ;;  %vm1224_vm14 = vweird.f32 %v1187_v20 }
 0x3ee   : > { %v1210_v23 = vmul.f32 %v2000_v17, %v1209_v18  ;;  %v1207_v28 = vsel %vm1206_vm9, %v1998_v12, %v1203_v48 }
 0x3ef   : > { %v1229_v34 = vmul.f32 1.25, %v1207_v28 }
 0x3f0   : > { %v1211_v24 = vmul.f32 0.5, %v1210_v23 }
 0x3f1   : > { %v1233_v27 = vmul.f32 %v1229_v34, %v2633_v19 }
 0x3f2   : > { %v1212_v29 = vsub.f32 1.5, %v1211_v24 }
 0x3f3   : > { %v2002_v30 = vpop.eup %2001  ;;  %v1236_v33 = vpack.c.bf16 %v1233_v27, %v1232_v26 }
 0x3f4   : > { %v1219_v35 = vmul.f32 %v2002_v30, %v1187_v20  ;;  %v1213_v36 = vmul.f32 %v2000_v17, %v1212_v29  ;;  %vm1225_vm13 = vweird.f32 %v2002_v30 }
 0x3f5   : > { %1310 = vmatmul.bf16.vlgmr.msra.gmra.mxu2 %v1236_v33  ;;  %vm1226_vm15 = vmor %vm1224_vm14, %vm1225_vm13 }
 0x3f6   : > { %v1220_v38 = vmul.f32 %v2002_v30, %v1219_v35  ;;  %v1217_v15 = vsel %vm1216_vm12, %v2000_v17, %v1213_v36 }
 0x3f7   : > { %v1230_v41 = vmul.f32 1.25, %v1217_v15 }
 0x3f8   : > { %v1221_v52 = vmul.f32 0.5, %v1220_v38 }
 0x3f9   : > { %v1234_v32 = vmul.f32 %v1230_v41, %v2637_v22  ;;  %v1341_v22 = vld [vmem:[%s2399_s2] sm:$0xff]  ;;  %s1720_s2 = sshll.u32 %s2209_s17, 3 }
 0x3fa   : > { %v1222_v57 = vsub.f32 1.5, %v1221_v52  ;;  %vm1345_vm2 = vcmp.ne.s32.totalorder %v1341_v22, 0  ;;  %s1439_s19 = scalar_lea.hbm %s2737_s9, %s1720_s2  ;;  %s1453_s30 = scalar_lea.hbm %s2738_s10, %s1720_s2 }
 0x3fb   : > { %s1443_s21 = sshll.u32 %s1439_s19, 4  ;;  %s1444_s21 = int_to_ptr.hbm [resolvable:$true] %s1443_s21 }
 0x3fc   : > { %v1223_v40 = vmul.f32 %v2002_v30, %v1222_v57  ;;  %s2101_s11 = sshra.s32 %s1444_s21, 4  ;;  %s2102_s11 = int_to_ptr.hbm [resolvable:$true] %s2101_s11 }
 0x3fd   : > { %s2103_s12 = scalar_lea.hbm %s2102_s11, 8  ;;  %p2108_p7 = scmp.lt.s32.totalorder %s2102_s11, %s2737_s9 }
 0x3fe   : > { %v1227_v42 = vsel %vm1226_vm15, %v2002_v30, %v1223_v40  ;;  %p2104_p4 = scmp.ne.s32.totalorder %s2102_s11, %s2103_s12  ;;  %p2109_p8 = scmp.lt.s32.totalorder %s2107_s20, %s2103_s12 }
 0x3ff   : > { %v1231_v44 = vmul.f32 1.25, %v1227_v42 }
 0x400   : > { %p2105_p5 = pnand %p2104_p4, %p2333_p3  ;;  %p2110_p10 = por %p2109_p8, %p2108_p7 }
 0x401   : > { %v1235_v45 = vmul.f32 %v1231_v44, %v2641_v63  ;;  %v1330_v63 = vld [vmem:[%s2394_s29 + $0x8] sm:$0xff]  ;;  %s1418_s29 = scalar_lea.sflag [#allocation5], %s2381_s18 }
 0x402   : > { %vm1334_vm4 = vcmp.ne.s32.totalorder %v1330_v63, 0  ;;  %p2106_p6 = pneg %p2105_p5 }
 0x403   : > { %v1237_v46 = vpack.c.bf16 %v1235_v45, %v1234_v32 }
 0x404   : > { %p2111_p11 = pnand %p2110_p10, %p2106_p6 }
 0x405   : > { %1315 = vmatmul.bf16.vlgmr.msra.gmra.mxu3 %v1237_v46 }
 0x478   : > { %v1311_v50 = vpop.f32.mrf.mxu2 }
 0x479   : > { %v1321_v51 = vmul.f32 1.442695, %v1311_v50 }
 0x47b   : > { %2003 = vpow2.f32 %v1321_v51 }
 0x480   : > { %v1313_v54 = vpop.f32.mrf.mxu2 }
 0x481   : > { %v2004_v53 = vpop.eup %2003  ;;  %v1323_v47 = vmul.f32 1.442695, %v1313_v54 }
 0x482   : > { %1353 = vadd.xlane.f32.xlu2 %v2004_v53  ;;  %v1337_v19 = vsel %vm1333_vm0, %v2004_v53, 0.0  ;;  %v1349_v55 = vsel %vm1345_vm2, %v2004_v53, 0.0 }
 0x483   : > { %2005 = vpow2.f32 %v1323_v47 }
 0x488   : > { %v1316_v58 = vpop.f32.mrf.mxu3 }
 0x489   : > { %v1325_v61 = vmul.f32 1.442695, %v1316_v58  ;;  %v2006_v43 = vpop.eup %2005 }
 0x48a   : > { %1361 = vadd.xlane.f32.xlu2 %v1337_v19  ;;  %v1350_v3 = vsel %vm1346_vm1, %v2006_v43, 0.0  ;;  %v1399_v4 = vadd.f32 %v2006_v43, %v2004_v53  ;;  %v1338_v10 = vsel %vm1334_vm4, %v2006_v43, 0.0 }
 0x48b   : > { %2007 = vpow2.f32 %v1325_v61  ;;  %v1405_v6 = vadd.f32 %v1350_v3, %v1349_v55 }
 0x490   : > { %v1318_v60 = vpop.f32.mrf.mxu3 }
 0x491   : > { %v2008_v59 = vpop.eup %2007  ;;  %v1327_v62 = vmul.f32 1.442695, %v1318_v60 }
 0x492   : > { %1357 = vadd.xlane.f32.xlu0 %v2008_v59  ;;  %1355 = vadd.xlane.f32.xlu2 %v2006_v43  ;;  %v1351_v5 = vsel %vm1347_vm3, %v2008_v59, 0.0  ;;  %v1400_v7 = vadd.f32 %v2008_v59, %v1399_v4  ;;  %v1339_v17 = vsel %vm1335_vm7, %v2008_v59, 0.0 }
 0x493   : > { %2009 = vpow2.f32 %v1327_v62  ;;  %v1406_v9 = vadd.f32 %v1405_v6, %v1351_v5 }
 0x499   : > { %v2010_v8 = vpop.eup %2009 }
 0x49a   : > { %1359 = vadd.xlane.f32.xlu1 %v2010_v8  ;;  %1363 = vadd.xlane.f32.xlu0 %v1338_v10  ;;  %v1340_v12 = vsel %vm1336_vm5, %v2010_v8, 0.0  ;;  %v1401_v13 = vadd.f32 %v2010_v8, %v1400_v7  ;;  %v1352_v25 = vsel %vm1348_vm6, %v2010_v8, 0.0 }
 0x49b   : > { %1367 = vadd.xlane.f32.xlu2 %v1340_v12  ;;  %v1407_v31 = vadd.f32 %v1406_v9, %v1352_v25 }
 0x49c   : > { %v1402_v16 = vadd.f32 %v1401_v13, %v1398_v11 }
 0x49d   : > { %v1408_v49 = vadd.f32 %v1407_v31, %v1404_v14 }
 0x49e   : > { %1403 = vst [vmem:[%s2406_s24] sm:$0xff] %v1402_v16 }
 0x49f   : > { %1409 = vst [vmem:[%s2408_s27] sm:$0xff] %v1408_v49 }
 0x4a2   : > { %1365 = vadd.xlane.f32.xlu1 %v1339_v17 }
 0x4a3   : > { %2114 = shalt.err (!%p2111_p11)
}
 0x4a4   : > { %1827 = dma.vmem_to_hbm [thread:$0]  (%p2333_p3), %s1442_s22, 128, %s1444_s21, %s1418_s29  }
 0x4a5   : > { %s1455_s24 = sshll.u32 %s2408_s27, 4  ;;  %s1457_s19 = sshll.u32 %s1453_s30, 4  ;;  %s1456_s24 = int_to_ptr.vmem [resolvable:$true] %s1455_s24  ;;  %s1458_s19 = int_to_ptr.hbm [resolvable:$true] %s1457_s19 }
 0x4a6   : > { %s1423_s25 = scalar_lea.sflag [#allocation10], %s2381_s18  ;;  %s2129_s28 = sshra.s32 %s1458_s19, 4  ;;  %s2130_s28 = int_to_ptr.hbm [resolvable:$true] %s2129_s28 }
 0x4a7   : > { %s2131_s17 = scalar_lea.hbm %s2130_s28, 8  ;;  %s2135_s13 = scalar_lea.hbm %s2738_s10, 16 }
 0x4a8   : > { %p2132_p12 = scmp.ne.s32.totalorder %s2130_s28, %s2131_s17  ;;  %p2136_p1 = scmp.lt.s32.totalorder %s2130_s28, %s2738_s10 }
 0x4a9   : > { %p2137_p2 = scmp.lt.s32.totalorder %s2135_s13, %s2131_s17 }
 0x4aa   : > { %p2133_p13 = pnand %p2132_p12, %p2333_p3 }
 0x4ab   : > { %p2138_p4 = por %p2137_p2, %p2136_p1 }
 0x4ac   : > { %p2134_p0 = pneg %p2133_p13 }
 0x4ae   : > { %p2139_p5 = pnand %p2138_p4, %p2134_p0 }
 0x4b0   : > { %2142 = shalt.err (!%p2139_p5)
}
 0x4b1   : > { %1828 = dma.vmem_to_hbm [thread:$0]  (%p2333_p3), %s1456_s24, 128, %s1458_s19, %s1423_s25   ;;  %vm1393_vm8 = vcmask 7168  }
 0x4f5   : > { %v1354_v48 = vpop.xlane.xlu2 %1353 }
 0x4f6   : > { %v1377_v18 = vadd.f32 1e-08, %v1354_v48 }
 0x4f8   : > { %2011 = vlog2.f32 %v1377_v18 }
 0x4fd   : > { %v1362_v20 = vpop.xlane.xlu2 %1361 }
 0x4fe   : > { %2013 = vlog2.f32 %v1362_v20  ;;  %v2012_v21 = vpop.eup %2011 }
 0x4ff   : > { %v1382_v28 = vmul.f32 0.6931472, %v2012_v21 }
 0x504   : > { %v2014_v23 = vpop.eup %2013 }
 0x505   : > { %v1370_v34 = vmul.f32 0.6931472, %v2014_v23  ;;  %v1356_v24 = vpop.xlane.xlu2 %1355  ;;  %v1358_v26 = vpop.xlane.xlu0 %1357 }
 0x506   : > { %v1378_v29 = vadd.f32 1e-08, %v1356_v24  ;;  %v1379_v38 = vadd.f32 1e-08, %v1358_v26 }
 0x507   : > { %v1389_v27 = vsub.f32 %v1370_v34, %v1382_v28 }
 0x508   : > { %2015 = vlog2.f32 %v1378_v29 }
 0x509   : > { %1394 = vst.msk [vmem:[%s2404_s4] sm:$0xff] %vm1393_vm8, %v1389_v27 }
 0x50d   : > { %v1360_v30 = vpop.xlane.xlu1 %1359  ;;  %v1364_v33 = vpop.xlane.xlu0 %1363 }
 0x50e   : > { %v1380_v35 = vadd.f32 1e-08, %v1360_v30  ;;  %2017 = vlog2.f32 %v1364_v33  ;;  %v1368_v36 = vpop.xlane.xlu2 %1367  ;;  %v2016_v52 = vpop.eup %2015 }
 0x50f   : > { %2019 = vlog2.f32 %v1368_v36  ;;  %v1384_v40 = vmul.f32 0.6931472, %v2016_v52 }
 0x510   : > { %2021 = vlog2.f32 %v1380_v35 }
 0x511   : > { %2023 = vlog2.f32 %v1379_v38 }
 0x514   : > { %v2018_v57 = vpop.eup %2017 }
 0x515   : > { %v2020_v15 = vpop.eup %2019  ;;  %v1372_v41 = vmul.f32 0.6931472, %v2018_v57  ;;  %v1366_v42 = vpop.xlane.xlu1 %1365 }
 0x516   : > { %v2022_v44 = vpop.eup %2021  ;;  %v1376_v32 = vmul.f32 0.6931472, %v2020_v15  ;;  %2025 = vlog2.f32 %v1366_v42 }
 0x517   : > { %v1388_v45 = vmul.f32 0.6931472, %v2022_v44  ;;  %v1390_v46 = vsub.f32 %v1372_v41, %v1384_v40  ;;  %v2024_v51 = vpop.eup %2023 }
 0x518   : > { %v1386_v54 = vmul.f32 0.6931472, %v2024_v51 }
 0x519   : > { %1395 = vst.msk [vmem:[%s2404_s4 + $0x8] sm:$0xff] %vm1393_vm8, %v1390_v46  ;;  %v1392_v50 = vsub.f32 %v1376_v32, %v1388_v45 }
 0x51b   : > { %1397 = vst.msk [vmem:[%s2404_s4 + $0x18] sm:$0xff] %vm1393_vm8, %v1392_v50 }
 0x51c   : > { %v2026_v53 = vpop.eup %2025 }
 0x51d   : > { %v1374_v56 = vmul.f32 0.6931472, %v2026_v53 }
 0x51f   : > { %v1391_v47 = vsub.f32 %v1374_v56, %v1386_v54 }
 0x521   : > { %1396 = vst.msk [vmem:[%s2404_s4 + $0x10] sm:$0xff] %vm1393_vm8, %v1391_v47 }
 0x522 PF: > { %s2763_s26 = sld [smem:[#allocation18_spill]] }
 0x523   : > { %s2764_s18 = sld [smem:[#allocation15_spill]] }
 0x528   : > { %p1849_p3 = scmp.ge.s32.totalorder %s2763_s26, 2 }
 0x529   : > { %s1479_s30 = sand.u32 1, %s2764_s18  }
 0x52a   : > { %p1839_p6 = pnand %p1849_p3, %p2343_p9  ;;  %s1480_s22 = scalar_lea.sflag [#allocation5], %s1479_s30 }
 0x52c   : > { %p1840_p7 = pneg %p1839_p6 }
 0x52e   : > { %2184 = dma.done.wait (%p1840_p7), %s1480_s22, 128  }
 0x52f   : > { %2186 = vsyncadd (%p1840_p7), %s1480_s22, 4294967168  ;;  %s1490_s21 = scalar_lea.sflag [#allocation10], %s1479_s30 }
 0x530   : > { %2188 = dma.done.wait (%p1840_p7), %s1490_s21, 128  }
 0x531   : > { %2190 = vsyncadd (%p1840_p7), %s1490_s21, 4294967168  ;;  %s29_s20 = sadd.s32 1, %s2763_s26   ;;  %s2766_s16 = sld [smem:[#allocation16_spill]] }
 0x532   : > { %p26_p8 = scmp.ge.s32.totalorder %s29_s20, 6   ;;  %s2767_s17 = sld [smem:[#allocation17_spill]] }
 0x533   : > { %s2768_s18 = sld [smem:[#allocation19_spill]]  ;;  %s2770_s13 = smov %s2197_s14 }
 0x534   : > { %s2769_s19 = sld [smem:[#allocation20_spill]]  ;;  %s2771_s14 = smov %s2201_s15 }
 0x535   : > { %s2772_s15 = smov %s2363_s23  ;;  %28 = sbr.rel (!%p26_p8) target bundleno = 12 (0xc), region = 135 }
 0x53a   :  { %1496 = vsyncpa [#allocation4], 1 }
 0x53b   :  { %1498 = vsyncpa [#allocation4 + $0x1], 1 }
 0x53c   :  { %1499 = vsyncpa [#allocation7], 1 }
 0x53d   :  { %1500 = vsyncpa [#allocation5], 1 }
 0x53e   :  { %1502 = vsyncpa [#allocation5 + $0x1], 1 }
 0x53f   :  { %1503 = vsyncpa [#allocation10], 1 }
 0x540   :  { %1505 = vsyncpa [#allocation10 + $0x1], 1 }

</bundles_post_ra>
